<compile_context>
chip_gen: v7x
topology: tpu7x:2x2x1
jax: 0.10.0
libtpu: 0.0.40
codegen_flags: <defaults>
</compile_context>

<pallas_src>
import functools

import jax
import jax.numpy as jnp
from jax.experimental import pallas as pl
from jax.experimental.pallas import tpu as pltpu

HIDDEN = [1000, 256, 256, 15]  # default FCNet config: first=in_dim, last=out_dim


def _round_up(v: int, m: int) -> int:
    return ((v + m - 1) // m) * m


def _fcnet_kernel(*refs):
    """refs = (x_ref, w0, b0, w1, b1, ..., wL, bL, o_ref). Fully fused MLP."""
    x_ref, *wb_refs, o_ref = refs
    n_layers = len(wb_refs) // 2
    h = x_ref[...]
    for i in range(n_layers):
        w = wb_refs[2 * i][...]
        b = wb_refs[2 * i + 1][...]
        # Cast activations to the weight dtype in VMEM (free for f32->f32, one VPU
        # pass for f32->bf16), MXU matmul with f32 accumulation, bias+ReLU in f32.
        h = jnp.dot(h.astype(w.dtype), w, preferred_element_type=jnp.float32) + b
        if i != n_layers - 1:  # the final ReLU was popped in the PyTorch module
            h = jnp.maximum(h, 0.0)
    o_ref[...] = h.astype(o_ref.dtype)


def prepare_params(params, compute_dtype=jnp.bfloat16):
    """One-time prep: weights cast to the streaming/compute dtype, biases as f32
    (1, F) rows. Hoisted out of the per-call path so no per-forward re-cast/copy."""
    cdt = jnp.dtype(compute_dtype)
    prepped = []
    for w, b in params:
        prepped.append(
            (jnp.asarray(w, cdt), jnp.asarray(b, jnp.float32).reshape(1, -1))
        )
    return prepped


@functools.partial(jax.jit, static_argnames=("batch_tile",))
def fcnet_forward(x, prepped_params, *, batch_tile=1024):
    """x: any shape (N, ...); flattened to (N, prod(...)) like x.view(N, -1)."""
    n = x.shape[0]
    x2d = x.reshape(n, -1)  # free for contiguous x; dtype left as stored in HBM

    n_layers = len(prepped_params)
    dims = [prepped_params[0][0].shape[0]] + [w.shape[1] for w, _ in prepped_params]
    assert x2d.shape[1] == dims[0], (x2d.shape, dims)
    out_dim = dims[-1]

    # Batch tile: multiple of 8 sublanes, capped by the (rounded-up) batch so small
    # batches run one right-sized step. The ragged last tile is a Pallas partial
    # block (OOB output rows are dropped), so no batch padding is materialized.
    tb = min(_round_up(batch_tile, 8), _round_up(n, 8))
    grid = (pl.cdiv(n, tb),)

    args = [x2d]
    in_specs = [pl.BlockSpec((tb, dims[0]), lambda i: (i, 0))]
    for w, b in prepped_params:
        args += [w, b]
        # Constant index_map -> weights/biases are DMA'd once and stay resident.
        in_specs += [
            pl.BlockSpec(w.shape, lambda i: (0, 0)),
            pl.BlockSpec(b.shape, lambda i: (0, 0)),
        ]

    flops = 2 * n * sum(dims[i] * dims[i + 1] for i in range(n_layers))
    bytes_accessed = (
        x2d.size * x2d.dtype.itemsize
        + sum(
            w.size * w.dtype.itemsize + b.size * b.dtype.itemsize
            for w, b in prepped_params
        )
        + n * out_dim * 4
    )
    cost = pl.CostEstimate(
        flops=flops, transcendentals=0, bytes_accessed=bytes_accessed
    )

    out = pl.pallas_call(
        _fcnet_kernel,
        out_shape=jax.ShapeDtypeStruct((n, out_dim), jnp.float32),
        grid_spec=pltpu.PrefetchScalarGridSpec(
            num_scalar_prefetch=0,
            grid=grid,
            in_specs=in_specs,
            out_specs=pl.BlockSpec((tb, out_dim), lambda i: (i, 0)),
        ),
        compiler_params=pltpu.CompilerParams(
            dimension_semantics=("parallel",),
            vmem_limit_bytes=32 * 1024 * 1024,
        ),
        cost_estimate=cost,
    )(*args)
    return out


def init_params(key, hidden):
    """Deterministic init mirroring nn.Linear's uniform(-1/sqrt(fan_in), +)."""
    params = []
    for i in range(len(hidden) - 1):
        fan_in, fan_out = hidden[i], hidden[i + 1]
        key, kw, kb = jax.random.split(key, 3)
        bound = 1.0 / jnp.sqrt(fan_in)
        w = jax.random.uniform(kw, (fan_in, fan_out), jnp.float32, -bound, bound)
        b = jax.random.uniform(kb, (fan_out,), jnp.float32, -bound, bound)
        params.append((w, b))
    return params


def fcnet_reference(x, params, compute_dtype=jnp.float32):
    """Pure-JAX reference matching the PyTorch forward (same dtype plumbing)."""
    h = x.reshape(x.shape[0], -1).astype(jnp.float32)
    n_layers = len(params)
    for i, (w, b) in enumerate(params):
        h = jnp.dot(
            h.astype(compute_dtype),
            w.astype(compute_dtype),
            preferred_element_type=jnp.float32,
        ) + b
        if i != n_layers - 1:
            h = jnp.maximum(h, 0.0)
    return h


if __name__ == "__main__":
    key = jax.random.PRNGKey(0)
    k_param, k_x = jax.random.split(key)

    params = init_params(k_param, HIDDEN)

    # Input: (batch=32, 10, 100) -> flattened inside forward to (32, 1000).
    x = jax.random.normal(k_x, (32, 10, 100), dtype=jnp.float32)

    # f32 path (matches the PyTorch forward up to f64-vs-f32).
    p_f32 = prepare_params(params, jnp.float32)
    out = jax.block_until_ready(fcnet_forward(x, p_f32))
    ref = fcnet_reference(x, params)
    assert out.shape == (32, HIDDEN[-1]), out.shape
    assert jnp.allclose(out, ref, atol=1e-3, rtol=1e-3), (
        float(jnp.max(jnp.abs(out - ref)))
    )

    # bf16-streaming path (default prep; recommended on v5e/v6e/v7x); f32 accumulate.
    p_bf16 = prepare_params(params)  # compute_dtype defaults to bfloat16
    out_bf16 = jax.block_until_ready(fcnet_forward(x, p_bf16))
    ref_bf16 = fcnet_reference(x, params, compute_dtype=jnp.bfloat16)
    assert out_bf16.shape == (32, HIDDEN[-1]), out_bf16.shape
    assert jnp.allclose(out_bf16, ref_bf16, atol=2e-2, rtol=2e-2), (
        float(jnp.max(jnp.abs(out_bf16 - ref_bf16)))
    )

    print("KERNEL_OK")
</pallas_src>

<mosaic_0001>
module attributes {stable_mosaic.version = 11 : i64} {
  func.func @_fcnet_kernel(%arg0: i32, %arg1: memref<32x1000xf32, #tpu.memory_space<vmem>>, %arg2: memref<1000x256xf32, #tpu.memory_space<vmem>>, %arg3: memref<1x256xf32, #tpu.memory_space<vmem>>, %arg4: memref<256x256xf32, #tpu.memory_space<vmem>>, %arg5: memref<1x256xf32, #tpu.memory_space<vmem>>, %arg6: memref<256x15xf32, #tpu.memory_space<vmem>>, %arg7: memref<1x15xf32, #tpu.memory_space<vmem>>, %arg8: memref<32x15xf32, #tpu.memory_space<vmem>>) attributes {dimension_semantics = [#tpu.dimension_semantics<parallel>], iteration_bounds = array<i64: 1>, scalar_prefetch = 0 : i64, scratch_operands = 0 : i64, tpu.core_type = #tpu.core_type<tc>, window_params = [{transform_indices = @transform_0, window_bounds = array<i64: 32, 1000>}, {pipeline_mode = #tpu.pipeline_mode<synchronous>, transform_indices = @transform_1, window_bounds = array<i64: 1000, 256>}, {pipeline_mode = #tpu.pipeline_mode<synchronous>, transform_indices = @transform_2, window_bounds = array<i64: 1, 256>}, {pipeline_mode = #tpu.pipeline_mode<synchronous>, transform_indices = @transform_3, window_bounds = array<i64: 256, 256>}, {pipeline_mode = #tpu.pipeline_mode<synchronous>, transform_indices = @transform_4, window_bounds = array<i64: 1, 256>}, {pipeline_mode = #tpu.pipeline_mode<synchronous>, transform_indices = @transform_5, window_bounds = array<i64: 256, 15>}, {pipeline_mode = #tpu.pipeline_mode<synchronous>, transform_indices = @transform_6, window_bounds = array<i64: 1, 15>}, {transform_indices = @transform_7, window_bounds = array<i64: 32, 15>}]} {
    %c0 = arith.constant 0 : index
    %c0_0 = arith.constant 0 : index
    %0 = vector.load %arg1[%c0, %c0_0] : memref<32x1000xf32, #tpu.memory_space<vmem>>, vector<32x1000xf32>
    %c0_1 = arith.constant 0 : index
    %c0_2 = arith.constant 0 : index
    %1 = vector.load %arg2[%c0_1, %c0_2] : memref<1000x256xf32, #tpu.memory_space<vmem>>, vector<1000x256xf32>
    %c0_3 = arith.constant 0 : index
    %c0_4 = arith.constant 0 : index
    %2 = vector.load %arg3[%c0_3, %c0_4] : memref<1x256xf32, #tpu.memory_space<vmem>>, vector<1x256xf32>
    %cst = arith.constant dense<0.000000e+00> : vector<32x256xf32>
    %3 = tpu.matmul %0, %1, %cst {dimension_numbers = #tpu.dot_dimension_numbers<[1], [0], [0], [1], [0, 0, 1, 1], [], []>} : vector<32x1000xf32>, vector<1000x256xf32>, vector<32x256xf32> -> vector<32x256xf32>
    %4 = vector.broadcast %2 : vector<1x256xf32> to vector<32x256xf32>
    %5 = arith.addf %3, %4 : vector<32x256xf32>
    %cst_5 = arith.constant 0.000000e+00 : f32
    %6 = vector.broadcast %cst_5 : f32 to vector<32x256xf32>
    %7 = arith.maximumf %5, %6 : vector<32x256xf32>
    %c0_6 = arith.constant 0 : index
    %c0_7 = arith.constant 0 : index
    %8 = vector.load %arg4[%c0_6, %c0_7] : memref<256x256xf32, #tpu.memory_space<vmem>>, vector<256x256xf32>
    %c0_8 = arith.constant 0 : index
    %c0_9 = arith.constant 0 : index
    %9 = vector.load %arg5[%c0_8, %c0_9] : memref<1x256xf32, #tpu.memory_space<vmem>>, vector<1x256xf32>
    %cst_10 = arith.constant dense<0.000000e+00> : vector<32x256xf32>
    %10 = tpu.matmul %7, %8, %cst_10 {dimension_numbers = #tpu.dot_dimension_numbers<[1], [0], [0], [1], [0, 0, 1, 1], [], []>} : vector<32x256xf32>, vector<256x256xf32>, vector<32x256xf32> -> vector<32x256xf32>
    %11 = vector.broadcast %9 : vector<1x256xf32> to vector<32x256xf32>
    %12 = arith.addf %10, %11 : vector<32x256xf32>
    %cst_11 = arith.constant 0.000000e+00 : f32
    %13 = vector.broadcast %cst_11 : f32 to vector<32x256xf32>
    %14 = arith.maximumf %12, %13 : vector<32x256xf32>
    %c0_12 = arith.constant 0 : index
    %c0_13 = arith.constant 0 : index
    %15 = vector.load %arg6[%c0_12, %c0_13] : memref<256x15xf32, #tpu.memory_space<vmem>>, vector<256x15xf32>
    %c0_14 = arith.constant 0 : index
    %c0_15 = arith.constant 0 : index
    %16 = vector.load %arg7[%c0_14, %c0_15] : memref<1x15xf32, #tpu.memory_space<vmem>>, vector<1x15xf32>
    %cst_16 = arith.constant dense<0.000000e+00> : vector<32x15xf32>
    %17 = tpu.matmul %14, %15, %cst_16 {dimension_numbers = #tpu.dot_dimension_numbers<[1], [0], [0], [1], [0, 0, 1, 1], [], []>} : vector<32x256xf32>, vector<256x15xf32>, vector<32x15xf32> -> vector<32x15xf32>
    %18 = vector.broadcast %16 : vector<1x15xf32> to vector<32x15xf32>
    %19 = arith.addf %17, %18 : vector<32x15xf32>
    %c0_17 = arith.constant 0 : index
    %c0_18 = arith.constant 0 : index
    %20 = vector.load %arg8[%c0_17, %c0_18] : memref<32x15xf32, #tpu.memory_space<vmem>>, vector<32x15xf32>
    tpu.vector_store %arg8[%c0_17, %c0_18], %19 {strides = array<i32>} : memref<32x15xf32, #tpu.memory_space<vmem>>, vector<32x15xf32>,
    return
  }
  func.func @transform_0(%arg0: i32) -> (i32, i32) {
    %c0_i32 = arith.constant 0 : i32
    %c0_i32_0 = arith.constant 0 : i32
    return %arg0, %c0_i32 : i32, i32
  }
  func.func @transform_1(%arg0: i32) -> (i32, i32) {
    %c0_i32 = arith.constant 0 : i32
    %c0_i32_0 = arith.constant 0 : i32
    %c0_i32_1 = arith.constant 0 : i32
    return %c0_i32, %c0_i32_0 : i32, i32
  }
  func.func @transform_2(%arg0: i32) -> (i32, i32) {
    %c0_i32 = arith.constant 0 : i32
    %c0_i32_0 = arith.constant 0 : i32
    %c0_i32_1 = arith.constant 0 : i32
    return %c0_i32, %c0_i32_0 : i32, i32
  }
  func.func @transform_3(%arg0: i32) -> (i32, i32) {
    %c0_i32 = arith.constant 0 : i32
    %c0_i32_0 = arith.constant 0 : i32
    %c0_i32_1 = arith.constant 0 : i32
    return %c0_i32, %c0_i32_0 : i32, i32
  }
  func.func @transform_4(%arg0: i32) -> (i32, i32) {
    %c0_i32 = arith.constant 0 : i32
    %c0_i32_0 = arith.constant 0 : i32
    %c0_i32_1 = arith.constant 0 : i32
    return %c0_i32, %c0_i32_0 : i32, i32
  }
  func.func @transform_5(%arg0: i32) -> (i32, i32) {
    %c0_i32 = arith.constant 0 : i32
    %c0_i32_0 = arith.constant 0 : i32
    %c0_i32_1 = arith.constant 0 : i32
    return %c0_i32, %c0_i32_0 : i32, i32
  }
  func.func @transform_6(%arg0: i32) -> (i32, i32) {
    %c0_i32 = arith.constant 0 : i32
    %c0_i32_0 = arith.constant 0 : i32
    %c0_i32_1 = arith.constant 0 : i32
    return %c0_i32, %c0_i32_0 : i32, i32
  }
  func.func @transform_7(%arg0: i32) -> (i32, i32) {
    %c0_i32 = arith.constant 0 : i32
    %c0_i32_0 = arith.constant 0 : i32
    return %arg0, %c0_i32 : i32, i32
  }
}

</mosaic_0001>

<bundles_post_ra>
// kernel: fcnet_forward.1
= control target key start
LH: loop header
LB: loop body
LE: loop exit
PB: predicated region body
PF: predicated region fallthrough
CT: control target
= control target key end

     0   :  { %12 = vsyncpa [#allocation3], 0  ;;  %s1470_s24 = smov [#allocation2]   ;;  %s1950_s0 = inlined_call_operand.vmem [shape: f32[32,1000], index: 0, kind: input, shape index: {}]   ;;  %s1951_s1 = inlined_call_operand.hbm [shape: f32[1000,256], index: 1, kind: input, shape index: {}]   ;;  %s1952_s2 = inlined_call_operand.vmem [shape: f32[1,256], index: 2, kind: input, shape index: {}]   ;;  %s1953_s3 = inlined_call_operand.vmem [shape: f32[256,256], index: 3, kind: input, shape index: {}]   ;;  %s1954_s4 = inlined_call_operand.vmem [shape: f32[1,256], index: 4, kind: input, shape index: {}]   ;;  %s1955_s5 = inlined_call_operand.vmem [shape: f32[256,15], index: 5, kind: input, shape index: {}]   ;;  %s1956_s6 = inlined_call_operand.vmem [shape: f32[1,15], index: 6, kind: input, shape index: {}]   ;;  %s1957_s7 = inlined_call_operand.vmem [shape: f32[32,15], index: 7, kind: output, shape index: {}]  }
   0x1   :  { %s20_s25 = sshll.u32 %s1470_s24, 4  ;;  %s1446_s28 = scalar_lea.hbm %s1951_s1, 32000  ;;  %s21_s25 = int_to_ptr.vmem [resolvable:$true] %s20_s25 }
   0x2   :  { %p1447_p0 = scmp.ne.s32.totalorder %s1951_s1, %s1446_s28  ;;  %p1450_p1 = scmp.lt.u32.totalorder %s1446_s28, %s1951_s1 }
   0x4   :  { %p1452_p2 = pnand %p1450_p1, %p1447_p0 }
   0x6   :  { %1455 = shalt.err (!%p1452_p2)
}
   0x7   :  { %s1456_s10 = scalar_lea.vmem %s21_s25, 32000  ;;  %p1461_p4 = scmp.lt.s32.totalorder %s21_s25, %s21_s25 }
   0x8   :  { %p1457_p3 = scmp.ne.s32.totalorder %s21_s25, %s1456_s10  ;;  %p1462_p5 = scmp.lt.s32.totalorder %s1456_s10, %s1456_s10 }
   0xa   :  { %p1463_p6 = por %p1462_p5, %p1461_p4 }
   0xc   :  { %p1464_p7 = pnand %p1463_p6, %p1457_p3 }
   0xe   :  { %1467 = shalt.err (!%p1464_p7)
}
   0xf   :  { %s1471_s11 = smov 256   ;;  %s1472_s12 = smov 16  }
  0x10   :  { %26 = dma.hbm_to_vmem [thread:$0]  %s1951_s1, 32000, %s21_s25, [#allocation3], %s1471_s11, %s1471_s11, %s1472_s12  }
  0x11   :  { %1468 = dma.done.wait [#allocation3], 32000  }
  0x12   :  { %1469 = vsyncadd [#allocation3], 4294935296  ;;  %v137_v0 = vld [vmem:[#allocation2 + $0x208] sm:$0xff]  ;;  %v139_v1 = vld [vmem:[#allocation2 + $0x218] sm:$0xff]  ;;  %vm334_vm0 = vcmask 850944   ;;  %vm1008_vm1 = vcmask 121856  }
  0x13   :  { %v136_v2 = vld [vmem:[#allocation2 + $0x200] sm:$0xff]  ;;  %v1131_v3 = vpack.c.bf16 %v139_v1, %v137_v0  ;;  %v138_v4 = vld [vmem:[#allocation2 + $0x210] sm:$0xff]  ;;  %v141_v5 = vld [vmem:[#allocation2 + $0x228] sm:$0xff] }
  0x14   :  { %v143_v6 = vld [vmem:[#allocation2 + $0x238] sm:$0xff]  ;;  %v1133_v7 = vpack.c.bf16 %v138_v4, %v136_v2  ;;  %v140_v9 = vld [vmem:[#allocation2 + $0x220] sm:$0xff]  ;;  %v142_v10 = vld [vmem:[#allocation2 + $0x230] sm:$0xff] }
  0x15   :  { %v1135_v8 = vpack.c.bf16 %v143_v6, %v141_v5  ;;  %v145_v11 = vld [vmem:[#allocation2 + $0x248] sm:$0xff]  ;;  %1132 = vmatprep.subr.bf16.mxu0 %v1131_v3  ;;  %v147_v12 = vld [vmem:[#allocation2 + $0x258] sm:$0xff]  ;;  %v1137_v13 = vpack.c.bf16 %v142_v10, %v140_v9  ;;  %v144_v15 = vld [vmem:[#allocation2 + $0x240] sm:$0xff] }
  0x16   :  { %1134 = vmatpush1.bf16.msra.mxu0 %v1133_v7  ;;  %v1139_v14 = vpack.c.bf16 %v147_v12, %v145_v11  ;;  %v146_v16 = vld [vmem:[#allocation2 + $0x250] sm:$0xff]  ;;  %v149_v17 = vld [vmem:[#allocation2 + $0x268] sm:$0xff]  ;;  %v151_v18 = vld [vmem:[#allocation2 + $0x278] sm:$0xff] }
  0x17   :  { %1136 = vmatprep.subr.bf16.mxu0 %v1135_v8  ;;  %v1141_v19 = vpack.c.bf16 %v146_v16, %v144_v15  ;;  %v1143_v20 = vpack.c.bf16 %v151_v18, %v149_v17  ;;  %v148_v21 = vld [vmem:[#allocation2 + $0x260] sm:$0xff]  ;;  %v150_v22 = vld [vmem:[#allocation2 + $0x270] sm:$0xff]  ;;  %v153_v23 = vld [vmem:[#allocation2 + $0x288] sm:$0xff] }
  0x18   :  { %v155_v24 = vld [vmem:[#allocation2 + $0x298] sm:$0xff]  ;;  %v1145_v25 = vpack.c.bf16 %v150_v22, %v148_v21  ;;  %v152_v27 = vld [vmem:[#allocation2 + $0x280] sm:$0xff]  ;;  %v154_v28 = vld [vmem:[#allocation2 + $0x290] sm:$0xff] }
  0x19   :  { %v1147_v26 = vpack.c.bf16 %v155_v24, %v153_v23  ;;  %v157_v29 = vld [vmem:[#allocation2 + $0x2a8] sm:$0xff]  ;;  %v159_v30 = vld [vmem:[#allocation2 + $0x2b8] sm:$0xff]  ;;  %v1149_v31 = vpack.c.bf16 %v154_v28, %v152_v27  ;;  %v156_v33 = vld [vmem:[#allocation2 + $0x2a0] sm:$0xff] }
  0x1a   :  { %1138 = vmatpush1.bf16.msra.mxu0 %v1137_v13  ;;  %v1151_v32 = vpack.c.bf16 %v159_v30, %v157_v29  ;;  %v158_v34 = vld [vmem:[#allocation2 + $0x2b0] sm:$0xff]  ;;  %v161_v35 = vld [vmem:[#allocation2 + $0x2c8] sm:$0xff]  ;;  %v163_v36 = vld [vmem:[#allocation2 + $0x2d8] sm:$0xff] }
  0x1b   :  { %1140 = vmatprep.subr.bf16.mxu0 %v1139_v14  ;;  %v1153_v37 = vpack.c.bf16 %v158_v34, %v156_v33  ;;  %v1155_v38 = vpack.c.bf16 %v163_v36, %v161_v35  ;;  %v160_v39 = vld [vmem:[#allocation2 + $0x2c0] sm:$0xff]  ;;  %v162_v40 = vld [vmem:[#allocation2 + $0x2d0] sm:$0xff]  ;;  %v43_v41 = vld [vmem:[%s1950_s0 + $0x18] sm:$0xff] }
  0x1c   :  { %v165_v42 = vld [vmem:[#allocation2 + $0x2e8] sm:$0xff]  ;;  %v167_v43 = vld [vmem:[#allocation2 + $0x2f8] sm:$0xff]  ;;  %500 = vmatprep.mubr.f32.mxu0 %v43_v41  ;;  %v1157_v44 = vpack.c.bf16 %v162_v40, %v160_v39  ;;  %v164_v46 = vld [vmem:[#allocation2 + $0x2e0] sm:$0xff] }
  0x1d   :  { %v1159_v45 = vpack.c.bf16 %v167_v43, %v165_v42  ;;  %v166_v47 = vld [vmem:[#allocation2 + $0x2f0] sm:$0xff]  ;;  %v169_v48 = vld [vmem:[#allocation2 + $0x308] sm:$0xff]  ;;  %v171_v49 = vld [vmem:[#allocation2 + $0x318] sm:$0xff] }
  0x1e   :  { %1142 = vmatpush1.bf16.msra.mxu0 %v1141_v19  ;;  %v1161_v50 = vpack.c.bf16 %v166_v47, %v164_v46  ;;  %v1163_v51 = vpack.c.bf16 %v171_v49, %v169_v48  ;;  %v168_v52 = vld [vmem:[#allocation2 + $0x300] sm:$0xff]  ;;  %v170_v53 = vld [vmem:[#allocation2 + $0x310] sm:$0xff]  ;;  %v173_v54 = vld [vmem:[#allocation2 + $0x328] sm:$0xff] }
  0x1f   :  { %1144 = vmatprep.subr.bf16.mxu0 %v1143_v20  ;;  %v175_v55 = vld [vmem:[#allocation2 + $0x338] sm:$0xff]  ;;  %v1165_v56 = vpack.c.bf16 %v170_v53, %v168_v52  ;;  %v172_v58 = vld [vmem:[#allocation2 + $0x320] sm:$0xff]  ;;  %v174_v59 = vld [vmem:[#allocation2 + $0x330] sm:$0xff] }
  0x20   :  { %v1167_v57 = vpack.c.bf16 %v175_v55, %v173_v54  ;;  %v177_v60 = vld [vmem:[#allocation2 + $0x348] sm:$0xff]  ;;  %v179_v61 = vld [vmem:[#allocation2 + $0x358] sm:$0xff]  ;;  %v1169_v62 = vpack.c.bf16 %v174_v59, %v172_v58  ;;  %v176_v0 = vld [vmem:[#allocation2 + $0x340] sm:$0xff] }
  0x21   :  { %v1171_v63 = vpack.c.bf16 %v179_v61, %v177_v60  ;;  %v178_v1 = vld [vmem:[#allocation2 + $0x350] sm:$0xff]  ;;  %v181_v2 = vld [vmem:[#allocation2 + $0x368] sm:$0xff]  ;;  %v183_v3 = vld [vmem:[#allocation2 + $0x378] sm:$0xff] }
  0x22   :  { %1146 = vmatpush1.bf16.msra.mxu0 %v1145_v25  ;;  %v1173_v4 = vpack.c.bf16 %v178_v1, %v176_v0  ;;  %v180_v5 = vld [vmem:[#allocation2 + $0x360] sm:$0xff]  ;;  %v182_v6 = vld [vmem:[#allocation2 + $0x370] sm:$0xff]  ;;  %v1175_v7 = vpack.c.bf16 %v183_v3, %v181_v2  ;;  %v185_v8 = vld [vmem:[#allocation2 + $0x388] sm:$0xff] }
  0x23   :  { %1148 = vmatprep.subr.bf16.mxu0 %v1147_v26  ;;  %v73_v9 = vld [vmem:[#allocation2 + $0x8] sm:$0xff]  ;;  %v75_v10 = vld [vmem:[#allocation2 + $0x18] sm:$0xff]  ;;  %v72_v13 = vld [vmem:[#allocation2] sm:$0xff]  ;;  %v1177_v16 = vpack.c.bf16 %v182_v6, %v180_v5 }
  0x24   :  { %v187_v11 = vld [vmem:[#allocation2 + $0x398] sm:$0xff]  ;;  %v1067_v12 = vpack.c.bf16 %v75_v10, %v73_v9  ;;  %v74_v14 = vld [vmem:[#allocation2 + $0x10] sm:$0xff]  ;;  %v184_v17 = vld [vmem:[#allocation2 + $0x380] sm:$0xff] }
  0x25   :  { %v1069_v15 = vpack.c.bf16 %v74_v14, %v72_v13  ;;  %v186_v18 = vld [vmem:[#allocation2 + $0x390] sm:$0xff]  ;;  %v77_v19 = vld [vmem:[#allocation2 + $0x28] sm:$0xff]  ;;  %v1179_v20 = vpack.c.bf16 %v187_v11, %v185_v8  ;;  %v79_v21 = vld [vmem:[#allocation2 + $0x38] sm:$0xff] }
  0x26   :  { %1150 = vmatpush1.bf16.msra.mxu0 %v1149_v31  ;;  %1068 = vmatprep.subr.bf16.mxu1 %v1067_v12  ;;  %v76_v22 = vld [vmem:[#allocation2 + $0x20] sm:$0xff]  ;;  %v78_v23 = vld [vmem:[#allocation2 + $0x30] sm:$0xff]  ;;  %v189_v24 = vld [vmem:[#allocation2 + $0x3a8] sm:$0xff]  ;;  %v1071_v26 = vpack.c.bf16 %v79_v21, %v77_v19  ;;  %v1181_v28 = vpack.c.bf16 %v186_v18, %v184_v17 }
  0x27   :  { %1152 = vmatprep.subr.bf16.mxu0 %v1151_v32  ;;  %1070 = vmatpush1.bf16.msra.mxu1 %v1069_v15  ;;  %v191_v25 = vld [vmem:[#allocation2 + $0x3b8] sm:$0xff]  ;;  %v1073_v27 = vpack.c.bf16 %v78_v23, %v76_v22  ;;  %v81_v29 = vld [vmem:[#allocation2 + $0x48] sm:$0xff]  ;;  %v80_v31 = vld [vmem:[#allocation2 + $0x40] sm:$0xff] }
  0x28   :  { %1072 = vmatprep.subr.bf16.mxu1 %v1071_v26  ;;  %v83_v30 = vld [vmem:[#allocation2 + $0x58] sm:$0xff]  ;;  %v1183_v32 = vpack.c.bf16 %v191_v25, %v189_v24  ;;  %v188_v33 = vld [vmem:[#allocation2 + $0x3a0] sm:$0xff]  ;;  %v190_v34 = vld [vmem:[#allocation2 + $0x3b0] sm:$0xff] }
  0x29   :  { %v1075_v35 = vpack.c.bf16 %v83_v30, %v81_v29  ;;  %v82_v36 = vld [vmem:[#allocation2 + $0x50] sm:$0xff]  ;;  %v85_v40 = vld [vmem:[#allocation2 + $0x68] sm:$0xff]  ;;  %v87_v41 = vld [vmem:[#allocation2 + $0x78] sm:$0xff]  ;;  %v1185_v42 = vpack.c.bf16 %v190_v34, %v188_v33 }
  0x2a   :  { %1154 = vmatpush1.bf16.msra.mxu0 %v1153_v37  ;;  %v193_v37 = vld [vmem:[#allocation2 + $0x3c8] sm:$0xff]  ;;  %v1077_v39 = vpack.c.bf16 %v82_v36, %v80_v31  ;;  %v192_v43 = vld [vmem:[#allocation2 + $0x3c0] sm:$0xff]  ;;  %v86_v46 = vld [vmem:[#allocation2 + $0x70] sm:$0xff] }
  0x2b   :  { %1156 = vmatprep.subr.bf16.mxu0 %v1155_v38  ;;  %1074 = vmatpush1.bf16.msra.mxu1 %v1073_v27  ;;  %v195_v38 = vld [vmem:[#allocation2 + $0x3d8] sm:$0xff]  ;;  %v194_v48 = vld [vmem:[#allocation2 + $0x3d0] sm:$0xff]  ;;  %v197_v49 = vld [vmem:[#allocation2 + $0x3e8] sm:$0xff] }
  0x2c   :  { %1076 = vmatprep.subr.bf16.mxu1 %v1075_v35  ;;  %v1187_v47 = vpack.c.bf16 %v195_v38, %v193_v37  ;;  %v89_v52 = vld [vmem:[#allocation2 + $0x88] sm:$0xff]  ;;  %v91_v53 = vld [vmem:[#allocation2 + $0x98] sm:$0xff]  ;;  %v88_v54 = vld [vmem:[#allocation2 + $0x80] sm:$0xff] }
  0x2d   :  { %v1083_v55 = vpack.c.bf16 %v91_v53, %v89_v52  ;;  %v196_v58 = vld [vmem:[#allocation2 + $0x3e0] sm:$0xff]  ;;  %v93_v59 = vld [vmem:[#allocation2 + $0xa8] sm:$0xff]  ;;  %v198_v61 = vld [vmem:[#allocation2 + $0x3f0] sm:$0xff] }
  0x2e   :  { %1158 = vmatpush1.bf16.msra.mxu0 %v1157_v44  ;;  %v1079_v44 = vpack.c.bf16 %v87_v41, %v85_v40  ;;  %v95_v0 = vld [vmem:[#allocation2 + $0xb8] sm:$0xff]  ;;  %v92_v3 = vld [vmem:[#allocation2 + $0xa0] sm:$0xff]  ;;  %v97_v5 = vld [vmem:[#allocation2 + $0xc8] sm:$0xff] }
  0x2f   :  { %1160 = vmatprep.subr.bf16.mxu0 %v1159_v45  ;;  %v84_v45 = vld [vmem:[#allocation2 + $0x60] sm:$0xff]  ;;  %1078 = vmatpush1.bf16.msra.mxu1 %v1077_v39  ;;  %v203_v1 = vld [vmem:[#allocation2 + $0x418] sm:$0xff]  ;;  %v1087_v2 = vpack.c.bf16 %v95_v0, %v93_v59  ;;  %v202_v10 = vld [vmem:[#allocation2 + $0x410] sm:$0xff] }
  0x30   :  { %1080 = vmatprep.subr.bf16.mxu1 %v1079_v44  ;;  %v99_v6 = vld [vmem:[#allocation2 + $0xd8] sm:$0xff]  ;;  %v200_v9 = vld [vmem:[#allocation2 + $0x400] sm:$0xff]  ;;  %v205_v11 = vld [vmem:[#allocation2 + $0x428] sm:$0xff] }
  0x31   :  { %v207_v13 = vld [vmem:[#allocation2 + $0x438] sm:$0xff]  ;;  %v1091_v14 = vpack.c.bf16 %v99_v6, %v97_v5  ;;  %v96_v15 = vld [vmem:[#allocation2 + $0xc0] sm:$0xff]  ;;  %v101_v17 = vld [vmem:[#allocation2 + $0xe8] sm:$0xff] }
  0x32   :  { %1162 = vmatpush1.bf16.msra.mxu0 %v1161_v50  ;;  %v199_v50 = vld [vmem:[#allocation2 + $0x3f8] sm:$0xff]  ;;  %v42_v19 = vld [vmem:[%s1950_s0 + $0x10] sm:$0xff]  ;;  %v204_v21 = vld [vmem:[#allocation2 + $0x420] sm:$0xff]  ;;  %v1199_v22 = vpack.c.bf16 %v207_v13, %v205_v11 }
  0x33   :  { %1164 = vmatprep.subr.bf16.mxu0 %v1163_v51  ;;  %v1081_v51 = vpack.c.bf16 %v86_v46, %v84_v45  ;;  %v1191_v60 = vpack.c.bf16 %v199_v50, %v197_v49  ;;  %v103_v18 = vld [vmem:[#allocation2 + $0xf8] sm:$0xff]  ;;  %v206_v23 = vld [vmem:[#allocation2 + $0x430] sm:$0xff]  ;;  %v209_v24 = vld [vmem:[#allocation2 + $0x448] sm:$0xff] }
  0x34   :  { %v51_v25 = vld [vmem:[%s1950_s0 + $0x58] sm:$0xff]  ;;  %v100_v29 = vld [vmem:[#allocation2 + $0xe0] sm:$0xff]  ;;  %v102_v30 = vld [vmem:[#allocation2 + $0xf0] sm:$0xff]  ;;  %v1201_v33 = vpack.c.bf16 %v206_v23, %v204_v21 }
  0x35   :  { %1082 = vmatpush1.bf16.msra.mxu1 %v1081_v51  ;;  %v211_v27 = vld [vmem:[#allocation2 + $0x458] sm:$0xff]  ;;  %v105_v31 = vld [vmem:[#allocation2 + $0x108] sm:$0xff]  ;;  %v208_v34 = vld [vmem:[#allocation2 + $0x440] sm:$0xff]  ;;  %v1097_v40 = vpack.c.bf16 %v102_v30, %v100_v29 }
  0x36   :  { %1166 = vmatpush1.bf16.msra.mxu0 %v1165_v56  ;;  %v90_v56 = vld [vmem:[#allocation2 + $0x90] sm:$0xff]  ;;  %1084 = vmatprep.subr.bf16.mxu1 %v1083_v55  ;;  %v1203_v36 = vpack.c.bf16 %v211_v27, %v209_v24  ;;  %v213_v38 = vld [vmem:[#allocation2 + $0x468] sm:$0xff]  ;;  %v59_v39 = vld [vmem:[%s1950_s0 + $0x98] sm:$0xff] }
  0x37   :  { %1168 = vmatprep.subr.bf16.mxu0 %v1167_v57  ;;  %v1189_v57 = vpack.c.bf16 %v194_v48, %v192_v43  ;;  %v50_v35 = vld [vmem:[%s1950_s0 + $0x50] sm:$0xff]  ;;  %v215_v41 = vld [vmem:[#allocation2 + $0x478] sm:$0xff]  ;;  %v104_v43 = vld [vmem:[#allocation2 + $0x100] sm:$0xff] }
  0x38   :  { %v210_v37 = vld [vmem:[#allocation2 + $0x450] sm:$0xff]  ;;  %v109_v45 = vld [vmem:[#allocation2 + $0x128] sm:$0xff]  ;;  %v111_v46 = vld [vmem:[#allocation2 + $0x138] sm:$0xff]  ;;  %v1207_v50 = vpack.c.bf16 %v215_v41, %v213_v38 }
  0x39   :  { %v106_v44 = vld [vmem:[#allocation2 + $0x110] sm:$0xff]  ;;  %v212_v48 = vld [vmem:[#allocation2 + $0x460] sm:$0xff]  ;;  %v217_v52 = vld [vmem:[#allocation2 + $0x488] sm:$0xff] }
  0x3a   :  { %1170 = vmatpush1.bf16.msra.mxu0 %v1169_v62  ;;  %v201_v62 = vld [vmem:[#allocation2 + $0x408] sm:$0xff]  ;;  %v58_v49 = vld [vmem:[%s1950_s0 + $0x90] sm:$0xff]  ;;  %v67_v53 = vld [vmem:[%s1950_s0 + $0xd8] sm:$0xff] }
  0x3b   :  { %1172 = vmatprep.subr.bf16.mxu0 %v1171_v63  ;;  %v1085_v63 = vpack.c.bf16 %v90_v56, %v88_v54  ;;  %v1195_v8 = vpack.c.bf16 %v203_v1, %v201_v62  ;;  %v214_v51 = vld [vmem:[#allocation2 + $0x470] sm:$0xff]  ;;  %v1101_v54 = vpack.c.bf16 %v106_v44, %v104_v43  ;;  %v219_v55 = vld [vmem:[#allocation2 + $0x498] sm:$0xff]  ;;  %v1103_v56 = vpack.c.bf16 %v111_v46, %v109_v45  ;;  %v113_v59 = vld [vmem:[#allocation2 + $0x148] sm:$0xff] }
  0x3c   :  { %v216_v62 = vld [vmem:[#allocation2 + $0x480] sm:$0xff]  ;;  %v1211_v0 = vpack.c.bf16 %v219_v55, %v217_v52  ;;  %v218_v1 = vld [vmem:[#allocation2 + $0x490] sm:$0xff]  ;;  %v223_v5 = vld [vmem:[#allocation2 + $0x4b8] sm:$0xff] }
  0x3d   :  { %1086 = vmatpush1.bf16.msra.mxu1 %v1085_v63  ;;  %v66_v63 = vld [vmem:[%s1950_s0 + $0xd0] sm:$0xff]  ;;  %v1213_v11 = vpack.c.bf16 %v218_v1, %v216_v62  ;;  %v220_v13 = vld [vmem:[#allocation2 + $0x4a0] sm:$0xff]  ;;  %v121_v21 = vld [vmem:[#allocation2 + $0x188] sm:$0xff] }
  0x3e   :  { %1174 = vmatpush1.bf16.msra.mxu0 %v1173_v4  ;;  %v94_v4 = vld [vmem:[#allocation2 + $0xb0] sm:$0xff]  ;;  %1088 = vmatprep.subr.bf16.mxu1 %v1087_v2  ;;  %v221_v2 = vld [vmem:[#allocation2 + $0x4a8] sm:$0xff]  ;;  %v231_v29 = vld [vmem:[#allocation2 + $0x4f8] sm:$0xff] }
  0x3f   :  { %1176 = vmatprep.subr.bf16.mxu0 %v1175_v7  ;;  %v1193_v7 = vpack.c.bf16 %v198_v61, %v196_v58  ;;  %v1089_v12 = vpack.c.bf16 %v94_v4, %v92_v3  ;;  %v110_v58 = vld [vmem:[#allocation2 + $0x130] sm:$0xff]  ;;  %v1209_v61 = vpack.c.bf16 %v214_v51, %v212_v48  ;;  %v45_v3 = vld [vmem:[%s1950_s0 + $0x28] sm:$0xff]  ;;  %v228_v38 = vld [vmem:[#allocation2 + $0x4e0] sm:$0xff] }
  0x40   :  { %v229_v27 = vld [vmem:[#allocation2 + $0x4e8] sm:$0xff]  ;;  %v124_v44 = vld [vmem:[#allocation2 + $0x1a0] sm:$0xff]  ;;  %v126_v45 = vld [vmem:[#allocation2 + $0x1b0] sm:$0xff] }
  0x41   :  { %1090 = vmatpush1.bf16.msra.mxu1 %v1089_v12  ;;  %v1215_v12 = vpack.c.bf16 %v223_v5, %v221_v2  ;;  %v129_v46 = vld [vmem:[#allocation2 + $0x1c8] sm:$0xff]  ;;  %v234_v51 = vld [vmem:[#allocation2 + $0x510] sm:$0xff]  ;;  %v236_v62 = vld [vmem:[#allocation2 + $0x520] sm:$0xff] }
  0x42   :  { %1178 = vmatpush1.bf16.msra.mxu0 %v1177_v16  ;;  %v98_v16 = vld [vmem:[#allocation2 + $0xd0] sm:$0xff]  ;;  %1092 = vmatprep.subr.bf16.mxu1 %v1091_v14  ;;  %v237_v52 = vld [vmem:[#allocation2 + $0x528] sm:$0xff]  ;;  %v243_v2 = vld [vmem:[#allocation2 + $0x558] sm:$0xff] }
  0x43   :  { %1180 = vmatprep.subr.bf16.mxu0 %v1179_v20  ;;  %v1197_v20 = vpack.c.bf16 %v202_v10, %v200_v9  ;;  %v1093_v26 = vpack.c.bf16 %v98_v16, %v96_v15  ;;  %v117_v9 = vld [vmem:[#allocation2 + $0x168] sm:$0xff]  ;;  %v119_v10 = vld [vmem:[#allocation2 + $0x178] sm:$0xff]  ;;  %v222_v14 = vld [vmem:[#allocation2 + $0x4b0] sm:$0xff] }
  0x44   :  { %v225_v15 = vld [vmem:[#allocation2 + $0x4c8] sm:$0xff]  ;;  %v1217_v23 = vpack.c.bf16 %v222_v14, %v220_v13  ;;  %v134_v5 = vld [vmem:[#allocation2 + $0x1f0] sm:$0xff]  ;;  %v247_v14 = vld [vmem:[#allocation2 + $0x578] sm:$0xff] }
  0x45   :  { %1094 = vmatpush1.bf16.msra.mxu1 %v1093_v26  ;;  %v226_v26 = vld [vmem:[#allocation2 + $0x4d0] sm:$0xff]  ;;  %v245_v13 = vld [vmem:[#allocation2 + $0x568] sm:$0xff] }
  0x46   :  { %1182 = vmatpush1.bf16.msra.mxu0 %v1181_v28  ;;  %v1095_v28 = vpack.c.bf16 %v103_v18, %v101_v17  ;;  %v227_v17 = vld [vmem:[#allocation2 + $0x4d8] sm:$0xff]  ;;  %v1111_v18 = vpack.c.bf16 %v119_v10, %v117_v9  ;;  %v240_v10 = vld [vmem:[#allocation2 + $0x540] sm:$0xff] }
  0x47   :  { %1184 = vmatprep.subr.bf16.mxu0 %v1183_v32  ;;  %v107_v32 = vld [vmem:[#allocation2 + $0x118] sm:$0xff]  ;;  %v1219_v24 = vpack.c.bf16 %v227_v17, %v225_v15  ;;  %v713_v17 = vld [vmem:[%s1953_s3 + $0x10] sm:$0xff] }
  0x48   :  { %1096 = vmatprep.subr.bf16.mxu1 %v1095_v28 }
  0x49   :  { %1098 = vmatpush1.bf16.msra.mxu1 %v1097_v40  ;;  %v233_v40 = vld [vmem:[#allocation2 + $0x508] sm:$0xff] }
  0x4a   :  { %1186 = vmatpush1.bf16.msra.mxu0 %v1185_v42  ;;  %v1099_v42 = vpack.c.bf16 %v107_v32, %v105_v31  ;;  %v120_v31 = vld [vmem:[#allocation2 + $0x180] sm:$0xff]  ;;  %v122_v32 = vld [vmem:[#allocation2 + $0x190] sm:$0xff] }
  0x4b   :  { %1188 = vmatprep.subr.bf16.mxu0 %v1187_v47  ;;  %v1205_v47 = vpack.c.bf16 %v210_v37, %v208_v34  ;;  %v127_v34 = vld [vmem:[#allocation2 + $0x1b8] sm:$0xff]  ;;  %v1223_v37 = vpack.c.bf16 %v231_v29, %v229_v27  ;;  %v1117_v41 = vpack.c.bf16 %v122_v32, %v120_v31  ;;  %v49_v27 = vld [vmem:[%s1950_s0 + $0x48] sm:$0xff]  ;;  %v717_v31 = vld [vmem:[%s1953_s3 + $0x30] sm:$0xff] }
  0x4c   :  { %1100 = vmatprep.subr.bf16.mxu1 %v1099_v42  ;;  %v235_v42 = vld [vmem:[#allocation2 + $0x518] sm:$0xff] }
  0x4d   :  { %1102 = vmatpush1.bf16.msra.mxu1 %v1101_v54  ;;  %v239_v54 = vld [vmem:[#allocation2 + $0x538] sm:$0xff] }
  0x4e   :  { %1190 = vmatpush1.bf16.msra.mxu0 %v1189_v57  ;;  %v108_v57 = vld [vmem:[#allocation2 + $0x120] sm:$0xff]  ;;  %1104 = vmatprep.subr.bf16.mxu1 %v1103_v56 }
  0x4f   :  { %1192 = vmatprep.subr.bf16.mxu0 %v1191_v60  ;;  %v115_v60 = vld [vmem:[#allocation2 + $0x158] sm:$0xff]  ;;  %v1105_v4 = vpack.c.bf16 %v110_v58, %v108_v57  ;;  %v128_v56 = vld [vmem:[#allocation2 + $0x1c0] sm:$0xff]  ;;  %v130_v57 = vld [vmem:[#allocation2 + $0x1d0] sm:$0xff] }
  0x50   :  { %v1107_v6 = vpack.c.bf16 %v115_v60, %v113_v59  ;;  %v133_v58 = vld [vmem:[#allocation2 + $0x1e8] sm:$0xff]  ;;  %v135_v59 = vld [vmem:[#allocation2 + $0x1f8] sm:$0xff]  ;;  %v1125_v1 = vpack.c.bf16 %v130_v57, %v128_v56 }
  0x51   :  { %1106 = vmatpush1.bf16.msra.mxu1 %v1105_v4  ;;  %v132_v4 = vld [vmem:[#allocation2 + $0x1e0] sm:$0xff] }
  0x52   :  { %1194 = vmatpush1.bf16.msra.mxu0 %v1193_v7  ;;  %v112_v7 = vld [vmem:[#allocation2 + $0x140] sm:$0xff]  ;;  %1108 = vmatprep.subr.bf16.mxu1 %v1107_v6  ;;  %v712_v6 = vld [vmem:[%s1953_s3 + $0x8] sm:$0xff] }
  0x53   :  { %1196 = vmatprep.subr.bf16.mxu0 %v1195_v8  ;;  %v114_v8 = vld [vmem:[#allocation2 + $0x150] sm:$0xff] }
  0x54   :  { %v1109_v16 = vpack.c.bf16 %v114_v8, %v112_v7  ;;  %v714_v7 = vld [vmem:[%s1953_s3 + $0x18] sm:$0xff] }
  0x55   :  { %501 = vmatmul.mubr.f32.vlgmr.msra.gmra.mrb[0].mxu0 %v42_v19  ;;  %v116_v19 = vld [vmem:[#allocation2 + $0x160] sm:$0xff]  ;;  %v1315_v15 = vpack.c.bf16 %v714_v7, %v712_v6 }
  0x56   :  { %1198 = vmatpush1.bf16.msra.mxu0 %v1197_v20  ;;  %506 = vmatprep.mubr.f32.mxu0 %v51_v25  ;;  %v118_v20 = vld [vmem:[#allocation2 + $0x170] sm:$0xff]  ;;  %v224_v25 = vld [vmem:[#allocation2 + $0x4c0] sm:$0xff] }
  0x57   :  { %1200 = vmatprep.subr.bf16.mxu0 %v1199_v22  ;;  %v123_v22 = vld [vmem:[#allocation2 + $0x198] sm:$0xff]  ;;  %1110 = vmatpush1.bf16.msra.mxu1 %v1109_v16  ;;  %v1113_v28 = vpack.c.bf16 %v118_v20, %v116_v19  ;;  %v711_v16 = vld [vmem:[%s1953_s3] sm:$0xff]  ;;  %v716_v19 = vld [vmem:[%s1953_s3 + $0x28] sm:$0xff] }
  0x58   :  { %1112 = vmatprep.subr.bf16.mxu1 %v1111_v18  ;;  %v1115_v30 = vpack.c.bf16 %v123_v22, %v121_v21  ;;  %v718_v20 = vld [vmem:[%s1953_s3 + $0x38] sm:$0xff]  ;;  %v1239_v21 = vpack.c.bf16 %v247_v14, %v245_v13  ;;  %v244_v22 = vld [vmem:[#allocation2 + $0x560] sm:$0xff]  ;;  %v262_v14 = vld [vmem:[#allocation2 + $0x5f0] sm:$0xff] }
  0x59   :  { %507 = vmatmul.mubr.f32.gmra.mrb[2].mxu0 %v50_v35  ;;  %v41_v35 = vld [vmem:[%s1950_s0 + $0x8] sm:$0xff]  ;;  %v1319_v29 = vpack.c.bf16 %v718_v20, %v716_v19  ;;  %v727_v7 = vld [vmem:[%s1953_s3 + $0x80] sm:$0xff]  ;;  %v733_v20 = vld [vmem:[%s1953_s3 + $0xb0] sm:$0xff] }
  0x5a   :  { %1202 = vmatpush1.bf16.msra.mxu0 %v1201_v33  ;;  %512 = vmatprep.mubr.f32.mxu0 %v59_v39  ;;  %v125_v33 = vld [vmem:[#allocation2 + $0x1a8] sm:$0xff]  ;;  %v230_v39 = vld [vmem:[#allocation2 + $0x4f0] sm:$0xff]  ;;  %v260_v13 = vld [vmem:[#allocation2 + $0x5e0] sm:$0xff] }
  0x5b   :  { %1204 = vmatprep.subr.bf16.mxu0 %v1203_v36  ;;  %v1221_v36 = vpack.c.bf16 %v226_v26, %v224_v25  ;;  %411 = vmatprep.mubr.f32.mxu1 %v41_v35  ;;  %v1119_v43 = vpack.c.bf16 %v127_v34, %v125_v33  ;;  %v1225_v48 = vpack.c.bf16 %v230_v39, %v228_v38  ;;  %v249_v25 = vld [vmem:[#allocation2 + $0x588] sm:$0xff]  ;;  %v251_v26 = vld [vmem:[#allocation2 + $0x598] sm:$0xff]  ;;  %v48_v38 = vld [vmem:[%s1950_s0 + $0x40] sm:$0xff] }
  0x5c   :  { %1114 = vmatpush1.bf16.msra.mxu1 %v1113_v28  ;;  %v1317_v28 = vpack.c.bf16 %v713_v17, %v711_v16  ;;  %v720_v33 = vld [vmem:[%s1953_s3 + $0x48] sm:$0xff]  ;;  %v722_v34 = vld [vmem:[%s1953_s3 + $0x58] sm:$0xff]  ;;  %v1243_v35 = vpack.c.bf16 %v251_v26, %v249_v25  ;;  %v731_v19 = vld [vmem:[%s1953_s3 + $0xa0] sm:$0xff] }
  0x5d   :  { %513 = vmatmul.mubr.f32.gmra.mrb[4].mxu0 %v58_v49  ;;  %1116 = vmatprep.subr.bf16.mxu1 %v1115_v30  ;;  %v1227_v49 = vpack.c.bf16 %v235_v42, %v233_v40  ;;  %v715_v30 = vld [vmem:[%s1953_s3 + $0x20] sm:$0xff]  ;;  %v253_v39 = vld [vmem:[#allocation2 + $0x5a8] sm:$0xff]  ;;  %v255_v40 = vld [vmem:[#allocation2 + $0x5b8] sm:$0xff] }
  0x5e   :  { %1206 = vmatpush1.bf16.msra.mxu0 %v1205_v47  ;;  %518 = vmatprep.mubr.f32.mxu0 %v67_v53  ;;  %v131_v47 = vld [vmem:[#allocation2 + $0x1d8] sm:$0xff]  ;;  %v1121_v53 = vpack.c.bf16 %v126_v45, %v124_v44  ;;  %v1321_v42 = vpack.c.bf16 %v717_v31, %v715_v30  ;;  %v719_v44 = vld [vmem:[%s1953_s3 + $0x40] sm:$0xff]  ;;  %v721_v45 = vld [vmem:[%s1953_s3 + $0x50] sm:$0xff] }
  0x5f   :  { %1208 = vmatprep.subr.bf16.mxu0 %v1207_v50  ;;  %v232_v50 = vld [vmem:[#allocation2 + $0x500] sm:$0xff]  ;;  %v1123_v55 = vpack.c.bf16 %v131_v47, %v129_v46  ;;  %v724_v47 = vld [vmem:[%s1953_s3 + $0x68] sm:$0xff]  ;;  %v1325_v56 = vpack.c.bf16 %v721_v45, %v719_v44  ;;  %v267_v16 = vld [vmem:[#allocation2 + $0x618] sm:$0xff] }
  0x60   :  { %1118 = vmatpush1.bf16.msra.mxu1 %v1117_v41  ;;  %v1229_v60 = vpack.c.bf16 %v234_v51, %v232_v50  ;;  %v57_v41 = vld [vmem:[%s1950_s0 + $0x88] sm:$0xff]  ;;  %v252_v50 = vld [vmem:[#allocation2 + $0x5a0] sm:$0xff]  ;;  %v254_v51 = vld [vmem:[#allocation2 + $0x5b0] sm:$0xff] }
  0x61   :  { %519 = vmatmul.mubr.f32.gmra.mrb[6].mxu0 %v66_v63  ;;  %1120 = vmatprep.subr.bf16.mxu1 %v1119_v43  ;;  %v238_v63 = vld [vmem:[#allocation2 + $0x530] sm:$0xff]  ;;  %v1323_v43 = vpack.c.bf16 %v722_v34, %v720_v33  ;;  %v264_v25 = vld [vmem:[#allocation2 + $0x600] sm:$0xff] }
  0x62   :  { %1210 = vmatpush1.bf16.msra.mxu0 %v1209_v61  ;;  %589 = vmatprep.mubr.f32.mxu0 %v45_v3  ;;  %v1231_v61 = vpack.c.bf16 %v239_v54, %v237_v52  ;;  %v1127_v3 = vpack.c.bf16 %v135_v59, %v133_v58  ;;  %v1233_v8 = vpack.c.bf16 %v238_v63, %v236_v62  ;;  %v56_v52 = vld [vmem:[%s1950_s0 + $0x80] sm:$0xff]  ;;  %v259_v54 = vld [vmem:[#allocation2 + $0x5d8] sm:$0xff]  ;;  %v725_v59 = vld [vmem:[%s1953_s3 + $0x70] sm:$0xff] }
  0x63   :  { %1212 = vmatprep.subr.bf16.mxu0 %v1211_v0  ;;  %v241_v0 = vld [vmem:[#allocation2 + $0x548] sm:$0xff]  ;;  %v723_v58 = vld [vmem:[%s1953_s3 + $0x60] sm:$0xff]  ;;  %v730_v62 = vld [vmem:[%s1953_s3 + $0x98] sm:$0xff] }
  0x64   :  { %1122 = vmatpush1.bf16.msra.mxu1 %v1121_v53  ;;  %v1235_v9 = vpack.c.bf16 %v243_v2, %v241_v0  ;;  %v257_v53 = vld [vmem:[#allocation2 + $0x5c8] sm:$0xff]  ;;  %v256_v0 = vld [vmem:[#allocation2 + $0x5c0] sm:$0xff]  ;;  %v266_v26 = vld [vmem:[#allocation2 + $0x610] sm:$0xff] }
  0x65   :  { %1124 = vmatprep.subr.bf16.mxu1 %v1123_v55  ;;  %v65_v55 = vld [vmem:[%s1950_s0 + $0xc8] sm:$0xff]  ;;  %v1251_v63 = vpack.c.bf16 %v259_v54, %v257_v53  ;;  %v64_v2 = vld [vmem:[%s1950_s0 + $0xc0] sm:$0xff]  ;;  %v1261_v34 = vpack.c.bf16 %v266_v26, %v264_v25  ;;  %v274_v53 = vld [vmem:[#allocation2 + $0x650] sm:$0xff] }
  0x66   :  { %1214 = vmatpush1.bf16.msra.mxu0 %v1213_v11  ;;  %v242_v11 = vld [vmem:[#allocation2 + $0x550] sm:$0xff]  ;;  %v735_v31 = vld [vmem:[%s1953_s3 + $0xc0] sm:$0xff]  ;;  %v61_v54 = vld [vmem:[%s1950_s0 + $0xa8] sm:$0xff] }
  0x67   :  { %1216 = vmatprep.subr.bf16.mxu0 %v1215_v12  ;;  %v1129_v12 = vpack.c.bf16 %v134_v5, %v132_v4  ;;  %v1237_v18 = vpack.c.bf16 %v242_v11, %v240_v10  ;;  %v263_v4 = vld [vmem:[#allocation2 + $0x5f8] sm:$0xff]  ;;  %v1329_v5 = vpack.c.bf16 %v725_v59, %v723_v58  ;;  %v732_v10 = vld [vmem:[%s1953_s3 + $0xa8] sm:$0xff]  ;;  %v44_v33 = vld [vmem:[%s1950_s0 + $0x20] sm:$0xff] }
  0x68   :  { %1126 = vmatpush1.bf16.msra.mxu1 %v1125_v1  ;;  %v258_v1 = vld [vmem:[#allocation2 + $0x5d0] sm:$0xff]  ;;  %v734_v11 = vld [vmem:[%s1953_s3 + $0xb8] sm:$0xff]  ;;  %v739_v45 = vld [vmem:[%s1953_s3 + $0xe0] sm:$0xff] }
  0x69   :  { %1128 = vmatprep.subr.bf16.mxu1 %v1127_v3  ;;  %v261_v3 = vld [vmem:[#allocation2 + $0x5e8] sm:$0xff]  ;;  %v743_v59 = vld [vmem:[%s1953_s3 + $0x100] sm:$0xff] }
  0x6a   :  { %1218 = vmatpush1.bf16.msra.mxu0 %v1217_v23  ;;  %v246_v23 = vld [vmem:[#allocation2 + $0x570] sm:$0xff]  ;;  %v756_v26 = vld [vmem:[%s1953_s3 + $0x168] sm:$0xff] }
  0x6b   :  { %1220 = vmatprep.subr.bf16.mxu0 %v1219_v24  ;;  %v40_v24 = vld [vmem:[%s1950_s0] sm:$0xff]  ;;  %v1241_v32 = vpack.c.bf16 %v246_v23, %v244_v22  ;;  %v736_v22 = vld [vmem:[%s1953_s3 + $0xc8] sm:$0xff]  ;;  %v738_v23 = vld [vmem:[%s1953_s3 + $0xd8] sm:$0xff] }
  0x6c   :  { %1130 = vmatpush1.bf16.msra.mxu1 %v1129_v12  ;;  %v1255_v12 = vpack.c.bf16 %v263_v4, %v261_v3  ;;  %v1339_v30 = vpack.c.bf16 %v738_v23, %v736_v22  ;;  %v278_v3 = vld [vmem:[#allocation2 + $0x670] sm:$0xff]  ;;  %v69_v4 = vld [vmem:[%s1950_s0 + $0xe8] sm:$0xff]  ;;  %v751_v23 = vld [vmem:[%s1953_s3 + $0x140] sm:$0xff] }
  0x6d   :  { %1316 = vmatprep.subr.bf16.mxu1 %v1315_v15  ;;  %v265_v15 = vld [vmem:[#allocation2 + $0x608] sm:$0xff] }
  0x6e   :  { %1222 = vmatpush1.bf16.msra.mxu0 %v1221_v36  ;;  %v248_v36 = vld [vmem:[#allocation2 + $0x580] sm:$0xff] }
  0x6f   :  { %1224 = vmatprep.subr.bf16.mxu0 %v1223_v37  ;;  %412 = vmatmul.mubr.f32.vlgmr.msra.gmra.mrb[0].mxu1 %v40_v24  ;;  %v250_v37 = vld [vmem:[#allocation2 + $0x590] sm:$0xff]  ;;  %v1259_v24 = vpack.c.bf16 %v267_v16, %v265_v15  ;;  %v280_v16 = vld [vmem:[#allocation2 + $0x680] sm:$0xff] }
  0x70   :  { %417 = vmatprep.mubr.f32.mxu1 %v49_v27  ;;  %1318 = vmatpush1.bf16.msra.mxu1 %v1317_v28  ;;  %v1245_v46 = vpack.c.bf16 %v250_v37, %v248_v36  ;;  %v269_v27 = vld [vmem:[#allocation2 + $0x628] sm:$0xff]  ;;  %v271_v28 = vld [vmem:[#allocation2 + $0x638] sm:$0xff] }
  0x71   :  { %1320 = vmatprep.subr.bf16.mxu1 %v1319_v29  ;;  %v1337_v29 = vpack.c.bf16 %v733_v20, %v731_v19  ;;  %v742_v36 = vld [vmem:[%s1953_s3 + $0xf8] sm:$0xff]  ;;  %v1263_v37 = vpack.c.bf16 %v271_v28, %v269_v27  ;;  %v285_v19 = vld [vmem:[#allocation2 + $0x6a8] sm:$0xff] }
  0x72   :  { %1226 = vmatpush1.bf16.msra.mxu0 %v1225_v48  ;;  %v726_v48 = vld [vmem:[%s1953_s3 + $0x78] sm:$0xff] }
  0x73   :  { %1228 = vmatprep.subr.bf16.mxu0 %v1227_v49  ;;  %418 = vmatmul.mubr.f32.gmra.mrb[2].mxu1 %v48_v38  ;;  %v1247_v49 = vpack.c.bf16 %v255_v40, %v253_v39  ;;  %v1327_v57 = vpack.c.bf16 %v726_v48, %v724_v47  ;;  %v268_v38 = vld [vmem:[#allocation2 + $0x620] sm:$0xff]  ;;  %v270_v39 = vld [vmem:[#allocation2 + $0x630] sm:$0xff]  ;;  %v53_v40 = vld [vmem:[%s1950_s0 + $0x68] sm:$0xff] }
  0x74   :  { %423 = vmatprep.mubr.f32.mxu1 %v57_v41  ;;  %1322 = vmatpush1.bf16.msra.mxu1 %v1321_v42  ;;  %v273_v41 = vld [vmem:[#allocation2 + $0x648] sm:$0xff]  ;;  %v275_v42 = vld [vmem:[#allocation2 + $0x658] sm:$0xff]  ;;  %v1265_v47 = vpack.c.bf16 %v270_v39, %v268_v38  ;;  %v52_v48 = vld [vmem:[%s1950_s0 + $0x60] sm:$0xff] }
  0x75   :  { %1324 = vmatprep.subr.bf16.mxu1 %v1323_v43  ;;  %v287_v20 = vld [vmem:[#allocation2 + $0x6b8] sm:$0xff]  ;;  %v760_v38 = vld [vmem:[%s1953_s3 + $0x188] sm:$0xff] }
  0x76   :  { %1230 = vmatpush1.bf16.msra.mxu0 %v1229_v60  ;;  %v1249_v60 = vpack.c.bf16 %v254_v51, %v252_v50  ;;  %v746_v50 = vld [vmem:[%s1953_s3 + $0x118] sm:$0xff]  ;;  %v1267_v51 = vpack.c.bf16 %v275_v42, %v273_v41  ;;  %v1279_v28 = vpack.c.bf16 %v287_v20, %v285_v19  ;;  %v288_v41 = vld [vmem:[#allocation2 + $0x6c0] sm:$0xff]  ;;  %v290_v42 = vld [vmem:[#allocation2 + $0x6d0] sm:$0xff] }
  0x77   :  { %1232 = vmatprep.subr.bf16.mxu0 %v1231_v61  ;;  %424 = vmatmul.mubr.f32.gmra.mrb[4].mxu1 %v56_v52  ;;  %v728_v61 = vld [vmem:[%s1953_s3 + $0x88] sm:$0xff]  ;;  %v272_v52 = vld [vmem:[#allocation2 + $0x640] sm:$0xff]  ;;  %v758_v27 = vld [vmem:[%s1953_s3 + $0x178] sm:$0xff] }
  0x78   :  { %429 = vmatprep.mubr.f32.mxu1 %v65_v55  ;;  %1326 = vmatpush1.bf16.msra.mxu1 %v1325_v56  ;;  %v1331_v6 = vpack.c.bf16 %v730_v62, %v728_v61  ;;  %v277_v55 = vld [vmem:[#allocation2 + $0x668] sm:$0xff]  ;;  %v279_v56 = vld [vmem:[#allocation2 + $0x678] sm:$0xff]  ;;  %v1269_v61 = vpack.c.bf16 %v274_v53, %v272_v52  ;;  %v60_v62 = vld [vmem:[%s1950_s0 + $0xa0] sm:$0xff] }
  0x79   :  { %1328 = vmatprep.subr.bf16.mxu1 %v1327_v57  ;;  %v762_v39 = vld [vmem:[%s1953_s3 + $0x198] sm:$0xff]  ;;  %v292_v53 = vld [vmem:[#allocation2 + $0x6e0] sm:$0xff]  ;;  %v310_v19 = vld [vmem:[#allocation2 + $0x770] sm:$0xff] }
  0x7a   :  { %1234 = vmatpush1.bf16.msra.mxu0 %v1233_v8  ;;  %v729_v8 = vld [vmem:[%s1953_s3 + $0x90] sm:$0xff]  ;;  %v313_v20 = vld [vmem:[#allocation2 + $0x788] sm:$0xff] }
  0x7b   :  { %1236 = vmatprep.subr.bf16.mxu0 %v1235_v9  ;;  %v1253_v9 = vpack.c.bf16 %v258_v1, %v256_v0  ;;  %430 = vmatmul.mubr.f32.gmra.mrb[6].mxu1 %v64_v2  ;;  %v1333_v17 = vpack.c.bf16 %v729_v8, %v727_v7  ;;  %v750_v0 = vld [vmem:[%s1953_s3 + $0x138] sm:$0xff]  ;;  %v1271_v1 = vpack.c.bf16 %v279_v56, %v277_v55  ;;  %v276_v2 = vld [vmem:[#allocation2 + $0x660] sm:$0xff]  ;;  %v297_v55 = vld [vmem:[#allocation2 + $0x708] sm:$0xff] }
  0x7c   :  { %1330 = vmatpush1.bf16.msra.mxu1 %v1329_v5  ;;  %v281_v5 = vld [vmem:[#allocation2 + $0x688] sm:$0xff]  ;;  %v299_v56 = vld [vmem:[#allocation2 + $0x718] sm:$0xff] }
  0x7d   :  { %1332 = vmatprep.subr.bf16.mxu1 %v1331_v6  ;;  %v283_v6 = vld [vmem:[#allocation2 + $0x698] sm:$0xff] }
  0x7e   :  { %1238 = vmatpush1.bf16.msra.mxu0 %v1237_v18  ;;  %v1335_v18 = vpack.c.bf16 %v734_v11, %v732_v10  ;;  %v749_v10 = vld [vmem:[%s1953_s3 + $0x130] sm:$0xff]  ;;  %v1273_v11 = vpack.c.bf16 %v278_v3, %v276_v2  ;;  %v1275_v15 = vpack.c.bf16 %v283_v6, %v281_v5  ;;  %v303_v2 = vld [vmem:[#allocation2 + $0x738] sm:$0xff]  ;;  %v300_v6 = vld [vmem:[#allocation2 + $0x720] sm:$0xff] }
  0x7f   :  { %1240 = vmatprep.subr.bf16.mxu0 %v1239_v21  ;;  %v1257_v21 = vpack.c.bf16 %v262_v14, %v260_v13  ;;  %v752_v13 = vld [vmem:[%s1953_s3 + $0x148] sm:$0xff]  ;;  %v754_v14 = vld [vmem:[%s1953_s3 + $0x158] sm:$0xff] }
  0x80   :  { %1334 = vmatpush1.bf16.msra.mxu1 %v1333_v17  ;;  %v282_v17 = vld [vmem:[#allocation2 + $0x690] sm:$0xff]  ;;  %v1355_v22 = vpack.c.bf16 %v754_v14, %v752_v13  ;;  %v309_v14 = vld [vmem:[#allocation2 + $0x768] sm:$0xff] }
  0x81   :  { %1336 = vmatprep.subr.bf16.mxu1 %v1335_v18  ;;  %v47_v18 = vld [vmem:[%s1950_s0 + $0x38] sm:$0xff]  ;;  %v1277_v25 = vpack.c.bf16 %v282_v17, %v280_v16  ;;  %v306_v13 = vld [vmem:[#allocation2 + $0x750] sm:$0xff] }
  0x82   :  { %1242 = vmatpush1.bf16.msra.mxu0 %v1241_v32  ;;  %v737_v32 = vld [vmem:[%s1953_s3 + $0xd0] sm:$0xff] }
  0x83   :  { %1244 = vmatprep.subr.bf16.mxu0 %v1243_v35  ;;  %v740_v35 = vld [vmem:[%s1953_s3 + $0xe8] sm:$0xff]  ;;  %v1341_v43 = vpack.c.bf16 %v737_v32, %v735_v31  ;;  %v291_v32 = vld [vmem:[#allocation2 + $0x6d8] sm:$0xff] }
  0x84   :  { %1338 = vmatpush1.bf16.msra.mxu1 %v1337_v29  ;;  %v1343_v44 = vpack.c.bf16 %v742_v36, %v740_v35  ;;  %v284_v29 = vld [vmem:[#allocation2 + $0x6a0] sm:$0xff]  ;;  %v289_v31 = vld [vmem:[#allocation2 + $0x6c8] sm:$0xff]  ;;  %v757_v36 = vld [vmem:[%s1953_s3 + $0x170] sm:$0xff] }
  0x85   :  { %1340 = vmatprep.subr.bf16.mxu1 %v1339_v30  ;;  %v286_v30 = vld [vmem:[#allocation2 + $0x6b0] sm:$0xff]  ;;  %v755_v35 = vld [vmem:[%s1953_s3 + $0x160] sm:$0xff] }
  0x86   :  { %1246 = vmatpush1.bf16.msra.mxu0 %v1245_v46  ;;  %v741_v46 = vld [vmem:[%s1953_s3 + $0xf0] sm:$0xff] }
  0x87   :  { %1248 = vmatprep.subr.bf16.mxu0 %v1247_v49  ;;  %v744_v49 = vld [vmem:[%s1953_s3 + $0x108] sm:$0xff]  ;;  %v1345_v57 = vpack.c.bf16 %v741_v46, %v739_v45  ;;  %v1361_v45 = vpack.c.bf16 %v757_v36, %v755_v35  ;;  %v1363_v46 = vpack.c.bf16 %v762_v39, %v760_v38  ;;  %v46_v35 = vld [vmem:[%s1950_s0 + $0x30] sm:$0xff]  ;;  %v55_v36 = vld [vmem:[%s1950_s0 + $0x78] sm:$0xff] }
  0x88   :  { %1342 = vmatpush1.bf16.msra.mxu1 %v1341_v43  ;;  %v1347_v58 = vpack.c.bf16 %v746_v50, %v744_v49  ;;  %v293_v43 = vld [vmem:[#allocation2 + $0x6e8] sm:$0xff]  ;;  %v1285_v49 = vpack.c.bf16 %v290_v42, %v288_v41  ;;  %v63_v38 = vld [vmem:[%s1950_s0 + $0xb8] sm:$0xff]  ;;  %v62_v41 = vld [vmem:[%s1950_s0 + $0xb0] sm:$0xff] }
  0x89   :  { %1344 = vmatprep.subr.bf16.mxu1 %v1343_v44  ;;  %v295_v44 = vld [vmem:[#allocation2 + $0x6f8] sm:$0xff]  ;;  %v764_v50 = vld [vmem:[%s1953_s3 + $0x1a8] sm:$0xff] }
  0x8a   :  { %1250 = vmatpush1.bf16.msra.mxu0 %v1249_v60  ;;  %v745_v60 = vld [vmem:[%s1953_s3 + $0x110] sm:$0xff]  ;;  %v1287_v52 = vpack.c.bf16 %v295_v44, %v293_v43  ;;  %v768_v39 = vld [vmem:[%s1953_s3 + $0x1c8] sm:$0xff]  ;;  %v71_v43 = vld [vmem:[%s1950_s0 + $0xf8] sm:$0xff] }
  0x8b   :  { %1252 = vmatprep.subr.bf16.mxu0 %v1251_v63  ;;  %v748_v63 = vld [vmem:[%s1953_s3 + $0x128] sm:$0xff]  ;;  %v1349_v7 = vpack.c.bf16 %v745_v60, %v743_v59  ;;  %v763_v59 = vld [vmem:[%s1953_s3 + $0x1a0] sm:$0xff]  ;;  %v765_v60 = vld [vmem:[%s1953_s3 + $0x1b0] sm:$0xff] }
  0x8c   :  { %1346 = vmatpush1.bf16.msra.mxu1 %v1345_v57  ;;  %v1351_v8 = vpack.c.bf16 %v750_v0, %v748_v63  ;;  %v296_v63 = vld [vmem:[#allocation2 + $0x700] sm:$0xff]  ;;  %v298_v0 = vld [vmem:[#allocation2 + $0x710] sm:$0xff]  ;;  %v1369_v3 = vpack.c.bf16 %v765_v60, %v763_v59 }
  0x8d   :  { %1348 = vmatprep.subr.bf16.mxu1 %v1347_v58  ;;  %v70_v44 = vld [vmem:[%s1950_s0 + $0xf0] sm:$0xff] }
  0x8e   :  { %1254 = vmatpush1.bf16.msra.mxu0 %v1253_v9  ;;  %v747_v9 = vld [vmem:[%s1953_s3 + $0x120] sm:$0xff] }
  0x8f   :  { %1256 = vmatprep.subr.bf16.mxu0 %v1255_v12  ;;  %v68_v12 = vld [vmem:[%s1950_s0 + $0xe0] sm:$0xff] }
  0x90   :  { %1350 = vmatpush1.bf16.msra.mxu1 %v1349_v7  ;;  %v302_v7 = vld [vmem:[#allocation2 + $0x730] sm:$0xff] }
  0x91   :  { %1352 = vmatprep.subr.bf16.mxu1 %v1351_v8  ;;  %v305_v8 = vld [vmem:[#allocation2 + $0x748] sm:$0xff] }
  0x92   :  { %1258 = vmatpush1.bf16.msra.mxu0 %v1257_v21  ;;  %v1353_v21 = vpack.c.bf16 %v749_v10, %v747_v9  ;;  %v307_v9 = vld [vmem:[#allocation2 + $0x758] sm:$0xff]  ;;  %v1297_v10 = vpack.c.bf16 %v302_v7, %v300_v6 }
  0x93   :  { %1260 = vmatprep.subr.bf16.mxu0 %v1259_v24  ;;  %v753_v24 = vld [vmem:[%s1953_s3 + $0x150] sm:$0xff] }
  0x94   :  { %1354 = vmatpush1.bf16.msra.mxu1 %v1353_v21  ;;  %v315_v21 = vld [vmem:[#allocation2 + $0x798] sm:$0xff] }
  0x95   :  { %590 = vmatmul.mubr.f32.vlgmr.msra.gmra.mrb[0].mxu0 %v44_v33  ;;  %v1357_v33 = vpack.c.bf16 %v753_v24, %v751_v23  ;;  %1356 = vmatprep.subr.bf16.mxu1 %v1355_v22  ;;  %v1307_v23 = vpack.c.bf16 %v315_v21, %v313_v20  ;;  %v312_v24 = vld [vmem:[#allocation2 + $0x780] sm:$0xff] }
  0x96   :  { %1262 = vmatpush1.bf16.msra.mxu0 %v1261_v34  ;;  %595 = vmatprep.mubr.f32.mxu0 %v53_v40  ;;  %v1359_v34 = vpack.c.bf16 %v758_v27, %v756_v26  ;;  %v1283_v40 = vpack.c.bf16 %v291_v32, %v289_v31  ;;  %v317_v26 = vld [vmem:[#allocation2 + $0x7a8] sm:$0xff]  ;;  %v319_v27 = vld [vmem:[#allocation2 + $0x7b8] sm:$0xff]  ;;  %v318_v31 = vld [vmem:[#allocation2 + $0x7b0] sm:$0xff] }
  0x97   :  { %1264 = vmatprep.subr.bf16.mxu0 %v1263_v37  ;;  %v1281_v37 = vpack.c.bf16 %v286_v30, %v284_v29  ;;  %v1311_v29 = vpack.c.bf16 %v319_v27, %v317_v26  ;;  %v316_v30 = vld [vmem:[#allocation2 + $0x7a0] sm:$0xff] }
  0x98   :  { %1358 = vmatpush1.bf16.msra.mxu1 %v1357_v33  ;;  %v1313_v32 = vpack.c.bf16 %v318_v31, %v316_v30  ;;  %v321_v33 = vld [vmem:[#allocation2 + $0x7c8] sm:$0xff] }
  0x99   :  { %596 = vmatmul.mubr.f32.gmra.mrb[2].mxu0 %v52_v48  ;;  %1360 = vmatprep.subr.bf16.mxu1 %v1359_v34  ;;  %v761_v48 = vld [vmem:[%s1953_s3 + $0x190] sm:$0xff]  ;;  %v320_v34 = vld [vmem:[#allocation2 + $0x7c0] sm:$0xff] }
  0x9a   :  { %1266 = vmatpush1.bf16.msra.mxu0 %v1265_v47  ;;  %601 = vmatprep.mubr.f32.mxu0 %v61_v54  ;;  %v759_v47 = vld [vmem:[%s1953_s3 + $0x180] sm:$0xff]  ;;  %v294_v54 = vld [vmem:[#allocation2 + $0x6f0] sm:$0xff] }
  0x9b   :  { %1268 = vmatprep.subr.bf16.mxu0 %v1267_v51  ;;  %v766_v51 = vld [vmem:[%s1953_s3 + $0x1b8] sm:$0xff]  ;;  %v1365_v57 = vpack.c.bf16 %v761_v48, %v759_v47  ;;  %v772_v48 = vld [vmem:[%s1953_s3 + $0x1e8] sm:$0xff] }
  0x9c   :  { %1362 = vmatpush1.bf16.msra.mxu1 %v1361_v45  ;;  %v1367_v58 = vpack.c.bf16 %v766_v51, %v764_v50  ;;  %v767_v45 = vld [vmem:[%s1953_s3 + $0x1c0] sm:$0xff] }
  0x9d   :  { %602 = vmatmul.mubr.f32.gmra.mrb[4].mxu0 %v60_v62  ;;  %1364 = vmatprep.subr.bf16.mxu1 %v1363_v46  ;;  %v1291_v62 = vpack.c.bf16 %v299_v56, %v297_v55  ;;  %v769_v46 = vld [vmem:[%s1953_s3 + $0x1d0] sm:$0xff]  ;;  %v771_v51 = vld [vmem:[%s1953_s3 + $0x1e0] sm:$0xff]  ;;  %v901_v55 = vld [vmem:[%s1955_s5 + $0x88] sm:$0xff] }
  0x9e   :  { %1270 = vmatpush1.bf16.msra.mxu0 %v1269_v61  ;;  %607 = vmatprep.mubr.f32.mxu0 %v69_v4  ;;  %v1289_v61 = vpack.c.bf16 %v294_v54, %v292_v53  ;;  %v1293_v4 = vpack.c.bf16 %v298_v0, %v296_v63  ;;  %v1373_v47 = vpack.c.bf16 %v769_v46, %v767_v45  ;;  %v900_v54 = vld [vmem:[%s1955_s5 + $0x80] sm:$0xff]  ;;  %v906_v46 = vld [vmem:[%s1955_s5 + $0xb0] sm:$0xff] }
  0x9f   :  { %1272 = vmatprep.subr.bf16.mxu0 %v1271_v1  ;;  %v301_v1 = vld [vmem:[#allocation2 + $0x728] sm:$0xff]  ;;  %v1379_v56 = vpack.c.bf16 %v901_v55, %v900_v54  ;;  %v890_v55 = vld [vmem:[%s1955_s5 + $0x30] sm:$0xff] }
  0xa0   :  { %1366 = vmatpush1.bf16.msra.mxu1 %v1365_v57  ;;  %v1295_v5 = vpack.c.bf16 %v303_v2, %v301_v1  ;;  %v324_v1 = vlaneseq }
  0xa1   :  { %608 = vmatmul.mubr.f32.gmra.mrb[6].mxu0 %v68_v12  ;;  %1368 = vmatprep.subr.bf16.mxu1 %v1367_v58  ;;  %v304_v12 = vld [vmem:[#allocation2 + $0x740] sm:$0xff] }
  0xa2   :  { %1274 = vmatpush1.bf16.msra.mxu0 %v1273_v11  ;;  %1018 = vmatprep.mubr.msk.f32.mxu0 %vm334_vm0, %v47_v18  ;;  %v1299_v11 = vpack.c.bf16 %v307_v9, %v305_v8  ;;  %v1301_v16 = vpack.c.bf16 %v306_v13, %v304_v12  ;;  %v308_v18 = vld [vmem:[#allocation2 + $0x760] sm:$0xff]  ;;  %v1823_v2 = vshrl.u32 %v324_v1, 7  ;;  %v893_v1 = vld [vmem:[%s1955_s5 + $0x48] sm:$0xff] }
  0xa3   :  { %1276 = vmatprep.subr.bf16.mxu0 %v1275_v15  ;;  %v311_v15 = vld [vmem:[#allocation2 + $0x778] sm:$0xff]  ;;  %v1305_v22 = vpack.c.bf16 %v310_v19, %v308_v18  ;;  %v902_v18 = vld [vmem:[%s1955_s5 + $0x90] sm:$0xff] }
  0xa4   :  { %1370 = vmatpush1.bf16.msra.mxu1 %v1369_v3  ;;  %v1303_v17 = vpack.c.bf16 %v311_v15, %v309_v14  ;;  %v326_v3 = vsub.s32 0, %v1823_v2  ;;  %v884_v14 = vld [vmem:[%s1955_s5] sm:$0xff]  ;;  %v885_v15 = vld [vmem:[%s1955_s5 + $0x8] sm:$0xff]  ;;  %v903_v19 = vld [vmem:[%s1955_s5 + $0x98] sm:$0xff] }
  0xa5   :  { %v1383_v27 = vpack.c.bf16 %v903_v19, %v902_v18  ;;  %v914_v18 = vld [vmem:[%s1955_s5 + $0xf0] sm:$0xff]  ;;  %v915_v19 = vld [vmem:[%s1955_s5 + $0xf8] sm:$0xff] }
  0xa6   :  { %1278 = vmatpush1.bf16.msra.mxu0 %v1277_v25  ;;  %v314_v25 = vld [vmem:[#allocation2 + $0x790] sm:$0xff] }
  0xa7   :  { %1280 = vmatprep.subr.bf16.mxu0 %v1279_v28  ;;  %v1309_v28 = vpack.c.bf16 %v314_v25, %v312_v24 }
  0xaa   :  { %1282 = vmatpush1.bf16.msra.mxu0 %v1281_v37  ;;  %v54_v37 = vld [vmem:[%s1950_s0 + $0x70] sm:$0xff] }
  0xab   :  { %1284 = vmatprep.subr.bf16.mxu0 %v1283_v40  ;;  %v770_v40 = vld [vmem:[%s1953_s3 + $0x1d8] sm:$0xff] }
  0xac   :  { %v1371_v42 = vpack.c.bf16 %v770_v40, %v768_v39 }
  0xae   :  { %1286 = vmatpush1.bf16.msra.mxu0 %v1285_v49  ;;  %1372 = vmatprep.subr.bf16.mxu1 %v1371_v42  ;;  %v774_v49 = vld [vmem:[%s1953_s3 + $0x1f8] sm:$0xff]  ;;  %v888_v42 = vld [vmem:[%s1955_s5 + $0x20] sm:$0xff] }
  0xaf   :  { %1288 = vmatprep.subr.bf16.mxu0 %v1287_v52  ;;  %1374 = vmatpush1.bf16.msra.mxu1 %v1373_v47  ;;  %v1375_v50 = vpack.c.bf16 %v774_v49, %v772_v48  ;;  %v773_v52 = vld [vmem:[%s1953_s3 + $0x1f0] sm:$0xff]  ;;  %v907_v47 = vld [vmem:[%s1955_s5 + $0xb8] sm:$0xff] }
  0xb0   :  { %v1377_v53 = vpack.c.bf16 %v773_v52, %v771_v51  ;;  %v1391_v54 = vpack.c.bf16 %v907_v47, %v906_v46 }
  0xb1   :  { %1376 = vmatprep.subr.bf16.mxu1 %v1375_v50 }
  0xb2   :  { %1290 = vmatpush1.bf16.msra.mxu0 %v1289_v61 }
  0xb3   :  { %1292 = vmatprep.subr.bf16.mxu0 %v1291_v62  ;;  %1378 = vmatpush1.bf16.msra.mxu1 %v1377_v53 }
  0xb4   :  { %1380 = vmatprep.subr.bf16.mxu1 %v1379_v56  ;;  %v891_v56 = vld [vmem:[%s1955_s5 + $0x38] sm:$0xff] }
  0xb6   :  { %1294 = vmatpush1.bf16.msra.mxu0 %v1293_v4  ;;  %v322_v4 = vld [vmem:[%s1952_s2] sm:$0x3] }
  0xb7   :  { %1296 = vmatprep.subr.bf16.mxu0 %v1295_v5  ;;  %v330_v5 = vsub.s32 1, %v1823_v2  ;;  %v327_v6 = vrot.slane %v322_v4, %v326_v3 }
  0xb9   :  { %v331_v7 = vrot.slane %v322_v4, %v330_v5  ;;  %v910_v4 = vld [vmem:[%s1955_s5 + $0xd0] sm:$0xff] }
  0xba   :  { %1298 = vmatpush1.bf16.msra.mxu0 %v1297_v10 }
  0xbb   :  { %1300 = vmatprep.subr.bf16.mxu0 %v1299_v11 }
  0xbe   :  { %1302 = vmatpush1.bf16.msra.mxu0 %v1301_v16 }
  0xbf   :  { %1304 = vmatprep.subr.bf16.mxu0 %v1303_v17 }
  0xc2   :  { %1306 = vmatpush1.bf16.msra.mxu0 %v1305_v22  ;;  %v1381_v22 = vpack.c.bf16 %v885_v15, %v884_v14  ;;  %v896_v15 = vld [vmem:[%s1955_s5 + $0x60] sm:$0xff] }
  0xc3   :  { %1308 = vmatprep.subr.bf16.mxu0 %v1307_v23 }
  0xc6   :  { %1310 = vmatpush1.bf16.msra.mxu0 %v1309_v28  ;;  %v886_v28 = vld [vmem:[%s1955_s5 + $0x10] sm:$0xff] }
  0xc7   :  { %1312 = vmatprep.subr.bf16.mxu0 %v1311_v29  ;;  %v887_v29 = vld [vmem:[%s1955_s5 + $0x18] sm:$0xff] }
  0xca   :  { %1314 = vmatpush1.bf16.msra.mxu0 %v1313_v32  ;;  %v904_v32 = vld [vmem:[%s1955_s5 + $0xa0] sm:$0xff] }
  0xcb   :  { %670 = vmatprep.subr.mxu0 %v321_v33  ;;  %v905_v33 = vld [vmem:[%s1955_s5 + $0xa8] sm:$0xff] }
  0xce   :  { %671 = vmatpush1.msra.mxu0 %v320_v34 }
  0xcf   :  { %679 = vmatmul.mubr.f32.vlgmr.msra.gmra.mrb[0].mxu0 %v46_v35 }
  0xd0   :  { %1019 = vmatprep.mubr.msk.f32.mxu0 %vm334_vm0, %v55_v36  ;;  %v1385_v36 = vpack.c.bf16 %v887_v29, %v886_v28 }
  0xd3   :  { %685 = vmatmul.mubr.f32.gmra.mrb[2].mxu0 %v54_v37 }
  0xd4   :  { %1020 = vmatprep.mubr.msk.f32.mxu0 %vm334_vm0, %v63_v38 }
  0xd7   :  { %691 = vmatmul.mubr.f32.gmra.mrb[4].mxu0 %v62_v41  ;;  %v1387_v41 = vpack.c.bf16 %v905_v33, %v904_v32 }
  0xd8   :  { %1021 = vmatprep.mubr.msk.f32.mxu0 %vm334_vm0, %v71_v43  ;;  %v889_v43 = vld [vmem:[%s1955_s5 + $0x28] sm:$0xff] }
  0xd9   :  { %v1389_v50 = vpack.c.bf16 %v889_v43, %v888_v42 }
  0xdb   :  { %697 = vmatmul.mubr.f32.gmra.mrb[6].mxu0 %v70_v44 }
 0x142   :  { %v413_v57 = vpop.f32.mrb[0].mxu1 }
 0x143   :  { %v415_v58 = vpop.f32.mrb[1].mxu1  ;;  %v414_v8 = vadd.f32 %v413_v57, %v327_v6 }
 0x144   :  { %v416_v9 = vadd.f32 %v415_v58, %v331_v7  ;;  %v908_v58 = vld [vmem:[%s1955_s5 + $0xc0] sm:$0xff] }
 0x146   :  { %v419_v59 = vpop.f32.mrb[2].mxu1 }
 0x147   :  { %v421_v60 = vpop.f32.mrb[3].mxu1  ;;  %v420_v12 = vadd.f32 %v419_v59, %v327_v6  ;;  %v909_v59 = vld [vmem:[%s1955_s5 + $0xc8] sm:$0xff] }
 0x148   :  { %v422_v17 = vadd.f32 %v421_v60, %v331_v7 }
 0x14a   :  { %v425_v61 = vpop.f32.mrb[4].mxu1 }
 0x14b   :  { %v427_v62 = vpop.f32.mrb[5].mxu1  ;;  %v426_v25 = vadd.f32 %v425_v61, %v327_v6  ;;  %v1393_v61 = vpack.c.bf16 %v891_v56, %v890_v55 }
 0x14c   :  { %v428_v31 = vadd.f32 %v427_v62, %v331_v7 }
 0x14e   :  { %v431_v63 = vpop.f32.mrb[6].mxu1 }
 0x14f   :  { %v433_v0 = vpop.f32.mrb[7].mxu1  ;;  %v432_v39 = vadd.f32 %v431_v63, %v327_v6  ;;  %v1395_v63 = vpack.c.bf16 %v909_v59, %v908_v58  ;;  %v911_v6 = vld [vmem:[%s1955_s5 + $0xd8] sm:$0xff] }
 0x150   :  { %v434_v45 = vadd.f32 %v433_v0, %v331_v7  ;;  %v892_v0 = vld [vmem:[%s1955_s5 + $0x40] sm:$0xff] }
 0x151   :  { %v1397_v7 = vpack.c.bf16 %v893_v1, %v892_v0 }
 0x1a2   :  { %v680_v10 = vpop.f32.mrb[0].mxu0 }
 0x1a3   :  { %v1412_v11 = vadd.f32 %v680_v10, %v414_v8  ;;  %v682_v13 = vpop.f32.mrb[1].mxu0  ;;  %v1399_v8 = vpack.c.bf16 %v911_v6, %v910_v4  ;;  %v895_v10 = vld [vmem:[%s1955_s5 + $0x58] sm:$0xff] }
 0x1a4   :  { %v1414_v16 = vadd.f32 %v682_v13, %v416_v9  ;;  %v894_v9 = vld [vmem:[%s1955_s5 + $0x50] sm:$0xff] }
 0x1a5   :  { %v703_v23 = vmax.f32 %v1412_v11, 0.0  ;;  %v912_v11 = vld [vmem:[%s1955_s5 + $0xe0] sm:$0xff]  ;;  %v1401_v13 = vpack.c.bf16 %v895_v10, %v894_v9 }
 0x1a6   :  { %v704_v20 = vmax.f32 %v1414_v16, 0.0  ;;  %v686_v21 = vpop.f32.mrb[2].mxu0  ;;  %v897_v16 = vld [vmem:[%s1955_s5 + $0x68] sm:$0xff] }
 0x1a7   :  { %v1416_v24 = vadd.f32 %v686_v21, %v420_v12  ;;  %v688_v26 = vpop.f32.mrb[3].mxu0  ;;  %v913_v12 = vld [vmem:[%s1955_s5 + $0xe8] sm:$0xff]  ;;  %v898_v21 = vld [vmem:[%s1955_s5 + $0x70] sm:$0xff] }
 0x1a8   :  { %v1418_v30 = vadd.f32 %v688_v26, %v422_v17  ;;  %851 = vmatprep.mubr.f32.mxu1 %v704_v20  ;;  %v1403_v14 = vpack.c.bf16 %v913_v12, %v912_v11  ;;  %v1405_v17 = vpack.c.bf16 %v897_v16, %v896_v15  ;;  %v1407_v20 = vpack.c.bf16 %v915_v19, %v914_v18 }
 0x1a9   :  { %852 = vmatmul.mubr.f32.vlgmr.msra.gmra.mrb[8].mxu1 %v703_v23  ;;  %v705_v37 = vmax.f32 %v1416_v24, 0.0  ;;  %v775_v24 = vld [vmem:[%s1954_s4] sm:$0x3] }
 0x1aa   :  { %v706_v34 = vmax.f32 %v1418_v30, 0.0  ;;  %v692_v35 = vpop.f32.mrb[4].mxu0  ;;  %1382 = vmatpush3.bf16.msra.mxu1 %v1381_v22  ;;  %v899_v22 = vld [vmem:[%s1955_s5 + $0x78] sm:$0xff]  ;;  %v784_v26 = vrot.slane %v775_v24, %v330_v5 }
 0x1ab   :  { %v1420_v38 = vadd.f32 %v692_v35, %v426_v25  ;;  %v694_v40 = vpop.f32.mrb[5].mxu0  ;;  %1384 = vmatprep.subr.bf16.mxu1 %v1383_v27  ;;  %v1409_v23 = vpack.c.bf16 %v899_v22, %v898_v21  ;;  %v780_v25 = vrot.slane %v775_v24, %v326_v3 }
 0x1ac   :  { %v1422_v44 = vadd.f32 %v694_v40, %v428_v31  ;;  %857 = vmatprep.mubr.f32.mxu1 %v706_v34 }
 0x1ad   :  { %858 = vmatmul.mubr.f32.gmra.mrb[10].mxu1 %v705_v37  ;;  %v707_v51 = vmax.f32 %v1420_v38, 0.0 }
 0x1ae   :  { %v708_v48 = vmax.f32 %v1422_v44, 0.0  ;;  %v698_v49 = vpop.f32.mrb[6].mxu0  ;;  %1386 = vmatpush3.bf16.msra.mxu1 %v1385_v36 }
 0x1af   :  { %v1424_v52 = vadd.f32 %v698_v49, %v432_v39  ;;  %v700_v53 = vpop.f32.mrb[7].mxu0  ;;  %1388 = vmatprep.subr.bf16.mxu1 %v1387_v41  ;;  %v1022_v49 = vld [vmem:[%s1956_s6] ss:$0 sm:$0xff] }
 0x1b0   :  { %v1426_v57 = vadd.f32 %v700_v53, %v434_v45  ;;  %863 = vmatprep.mubr.f32.mxu1 %v708_v48 }
 0x1b1   :  { %864 = vmatmul.mubr.f32.gmra.mrb[12].mxu1 %v707_v51  ;;  %v709_v62 = vmax.f32 %v1424_v52, 0.0 }
 0x1b2   :  { %v710_v60 = vmax.f32 %v1426_v57, 0.0  ;;  %1390 = vmatpush3.bf16.msra.mxu1 %v1389_v50 }
 0x1b3   :  { %1392 = vmatprep.subr.bf16.mxu1 %v1391_v54 }
 0x1b4   :  { %869 = vmatprep.mubr.f32.mxu1 %v710_v60 }
 0x1b5   :  { %870 = vmatmul.mubr.f32.gmra.mrb[14].mxu1 %v709_v62 }
 0x1b6   :  { %1394 = vmatpush3.bf16.msra.mxu1 %v1393_v61 }
 0x1b7   :  { %1396 = vmatprep.subr.bf16.mxu1 %v1395_v63 }
 0x1ba   :  { %1398 = vmatpush3.bf16.msra.mxu1 %v1397_v7 }
 0x1bb   :  { %1400 = vmatprep.subr.bf16.mxu1 %v1399_v8 }
 0x1be   :  { %1402 = vmatpush3.bf16.msra.mxu1 %v1401_v13 }
 0x1bf   :  { %1404 = vmatprep.subr.bf16.mxu1 %v1403_v14 }
 0x1c2   :  { %1406 = vmatpush3.bf16.msra.mxu1 %v1405_v17 }
 0x1c3   :  { %1408 = vmatprep.subr.bf16.mxu1 %v1407_v20 }
 0x1c6   :  { %1410 = vmatpush3.bf16.msra.mxu1 %v1409_v23 }
 0x27c   :  { %v853_v27 = vpop.f32.mrb[8].mxu1 }
 0x27d   :  { %v854_v28 = vadd.f32 %v853_v27, %v780_v25  ;;  %v855_v29 = vpop.f32.mrb[9].mxu1 }
 0x27e   :  { %v856_v30 = vadd.f32 %v855_v29, %v784_v26 }
 0x27f   :  { %v876_v33 = vmax.f32 %v854_v28, 0.0 }
 0x280   :  { %v877_v31 = vmax.f32 %v856_v30, 0.0  ;;  %v859_v32 = vpop.f32.mrb[10].mxu1 }
 0x281   :  { %v860_v34 = vadd.f32 %v859_v32, %v780_v25  ;;  %v861_v35 = vpop.f32.mrb[11].mxu1 }
 0x282   :  { %v862_v36 = vadd.f32 %v861_v35, %v784_v26  ;;  %987 = vmatprep.mubr.f32.mxu1 %v877_v31 }
 0x283   :  { %988 = vmatmul.mubr.f32.vlgmr.msra.gmra.mrb[16].mxu1 %v876_v33  ;;  %v878_v39 = vmax.f32 %v860_v34, 0.0 }
 0x284   :  { %v879_v37 = vmax.f32 %v862_v36, 0.0  ;;  %v865_v38 = vpop.f32.mrb[12].mxu1 }
 0x285   :  { %v866_v40 = vadd.f32 %v865_v38, %v780_v25  ;;  %v867_v3 = vpop.f32.mrb[13].mxu1 }
 0x286   :  { %v868_v41 = vadd.f32 %v867_v3, %v784_v26  ;;  %992 = vmatprep.mubr.f32.mxu1 %v879_v37 }
 0x287   :  { %993 = vmatmul.mubr.f32.gmra.mrb[18].mxu1 %v878_v39  ;;  %v880_v42 = vmax.f32 %v866_v40, 0.0 }
 0x288   :  { %v881_v2 = vmax.f32 %v868_v41, 0.0  ;;  %v871_v5 = vpop.f32.mrb[14].mxu1 }
 0x289   :  { %v872_v43 = vadd.f32 %v871_v5, %v780_v25  ;;  %v873_v44 = vpop.f32.mrb[15].mxu1 }
 0x28a   :  { %v874_v45 = vadd.f32 %v873_v44, %v784_v26  ;;  %997 = vmatprep.mubr.f32.mxu1 %v881_v2 }
 0x28b   :  { %998 = vmatmul.mubr.f32.gmra.mrb[20].mxu1 %v880_v42  ;;  %v882_v47 = vmax.f32 %v872_v43, 0.0 }
 0x28c   :  { %v883_v46 = vmax.f32 %v874_v45, 0.0 }
 0x28e   :  { %1002 = vmatprep.mubr.f32.mxu1 %v883_v46 }
 0x28f   :  { %1003 = vmatmul.mubr.f32.gmra.mrb[22].mxu1 %v882_v47 }
 0x356   :  { %v1055_v48 = vpop.f32.mrb[16].mxu1 }
 0x357   :  { %v1056_v50 = vpop.f32.mrb[17].mxu1 }
 0x358   :  { %v1057_v51 = vadd.f32 %v1056_v50, %v1055_v48 }
 0x35a   :  { %v990_v52 = vadd.f32 %v1057_v51, %v1022_v49  ;;  %v1058_v53 = vpop.f32.mrb[18].mxu1 }
 0x35b   :  { %v1059_v54 = vpop.f32.mrb[19].mxu1 }
 0x35c   :  { %1009 = vst.msk [vmem:[%s1957_s7] sm:$0xff] %vm1008_vm1, %v990_v52  ;;  %v1060_v55 = vadd.f32 %v1059_v54, %v1058_v53 }
 0x35e   :  { %v995_v56 = vadd.f32 %v1060_v55, %v1022_v49  ;;  %v1061_v57 = vpop.f32.mrb[20].mxu1 }
 0x35f   :  { %v1062_v58 = vpop.f32.mrb[21].mxu1 }
 0x360   :  { %1010 = vst.msk [vmem:[%s1957_s7 + $0x8] sm:$0xff] %vm1008_vm1, %v995_v56  ;;  %v1063_v59 = vadd.f32 %v1062_v58, %v1061_v57 }
 0x362   :  { %v1000_v60 = vadd.f32 %v1063_v59, %v1022_v49  ;;  %v1064_v61 = vpop.f32.mrb[22].mxu1 }
 0x363   :  { %v1065_v62 = vpop.f32.mrb[23].mxu1 }
 0x364   :  { %1011 = vst.msk [vmem:[%s1957_s7 + $0x10] sm:$0xff] %vm1008_vm1, %v1000_v60  ;;  %v1066_v63 = vadd.f32 %v1065_v62, %v1064_v61 }
 0x366   :  { %v1005_v0 = vadd.f32 %v1066_v63, %v1022_v49 }
 0x368   :  { %1012 = vst.msk [vmem:[%s1957_s7 + $0x18] sm:$0xff] %vm1008_vm1, %v1005_v0 }
 0x369   :  { %1017 = vsyncpa [#allocation3], 1 }

</bundles_post_ra>
